<compile_context>
chip_gen: v6e
topology: v6e:2x2x1
jax: 0.10.0
libtpu: 0.0.40
codegen_flags: <defaults>
</compile_context>

<pallas_src>
import math
import jax
import jax.numpy as jnp
from jax.experimental import pallas as pl
from jax.experimental.pallas import tpu as pltpu

# ---------------- config (small synthetic RoBERTa) ----------------
VOCAB    = 100
HIDDEN   = 32
N_LAYERS = 2
N_HEADS  = 2
HEAD_DIM = HIDDEN // N_HEADS
INTER    = 64
MAX_POS  = 64
PAD_ID   = 1          # RoBERTa pad token id
LN_EPS   = 1e-5
BATCH    = 2
SEQ      = 8
BS       = BATCH * SEQ
LANE     = 128        # lane-dense classifier output width
CLS_ROWS = 8          # sublane-padded CLS slab height


# ---------------- in-kernel helpers ----------------
def _layer_norm(x, g, b):
    mu = jnp.mean(x, axis=-1, keepdims=True)
    var = jnp.mean((x - mu) ** 2, axis=-1, keepdims=True)
    return (x - mu) * jax.lax.rsqrt(var + LN_EPS) * g + b


def _gelu(x):
    # TODO(synk): HF RoBERTa uses exact erf-GELU; tanh approximation used here.
    return 0.5 * x * (1.0 + jnp.tanh(0.7978845608028654 * (x + 0.044715 * x * x * x)))


def _bf16(x):
    return x.astype(jnp.bfloat16)


# ---------------- fused forward kernel ----------------
def roberta_fwd_kernel(emb_ref, mask_ref, embg_ref, embb_ref,
                       wqkv_ref, bqkv_ref, wo_ref, bo_ref,
                       ln1g_ref, ln1b_ref,
                       w1_ref, b1_ref, w2_ref, b2_ref,
                       ln2g_ref, ln2b_ref,
                       clsw_ref, clsb_ref,
                       out_ref):
    # embedding LayerNorm fused in (the gather itself stays in XLA glue)
    x = _layer_norm(emb_ref[...], embg_ref[...], embb_ref[...])      # (B*S, H) f32

    # hoist the additive-mask (1,S)->(S,S) broadcast out of the layer/head loops
    mask = mask_ref[...]                                             # (B, S)
    mask_bias = [jnp.broadcast_to(mask[b:b + 1, :], (SEQ, SEQ))
                 for b in range(BATCH)]                              # B x (S, S) f32

    for l in range(N_LAYERS):                                        # unrolled
        # ---- attention: ONE fused QKV projection (2-D MXU dot) ----
        # (attention scale is pre-folded into the Q columns of wqkv at init)
        qkv = jnp.dot(_bf16(x), wqkv_ref[l],
                      preferred_element_type=jnp.float32) + bqkv_ref[l]   # (B*S, 3H)
        qkv_bf = _bf16(qkv)          # single full cast; q/k/v sliced from this copy

        # per-(batch, head) scores/context: inherent tiny matmuls at S=8,
        # head_dim=16.  Results stay as values and are concatenated (no masked
        # scatter stores, no scratch round trip).
        ctx_rows = []
        for b in range(BATCH):
            r0 = b * SEQ
            head_ctx = []
            for h in range(N_HEADS):
                c = h * HEAD_DIM
                q = qkv_bf[r0:r0 + SEQ, c:c + HEAD_DIM]
                k = qkv_bf[r0:r0 + SEQ, HIDDEN + c:HIDDEN + c + HEAD_DIM]
                v = qkv_bf[r0:r0 + SEQ, 2 * HIDDEN + c:2 * HIDDEN + c + HEAD_DIM]
                s = jax.lax.dot_general(
                    q, k, (((1,), (1,)), ((), ())),
                    preferred_element_type=jnp.float32) + mask_bias[b]    # (S, S)
                s = s - jnp.max(s, axis=-1, keepdims=True)
                p = jnp.exp(s)
                p = p * pl.reciprocal(jnp.sum(p, axis=-1, keepdims=True), approx=True)
                head_ctx.append(jnp.dot(_bf16(p), v,
                                        preferred_element_type=jnp.float32))
            ctx_rows.append(jnp.concatenate(head_ctx, axis=1))       # (S, H) f32
        ctx = _bf16(jnp.concatenate(ctx_rows, axis=0))               # (B*S, H) bf16

        # ---- single 2-D out-projection over the assembled context ----
        attn = jnp.dot(ctx, wo_ref[l],
                       preferred_element_type=jnp.float32) + bo_ref[l]
        x = _layer_norm(x + attn, ln1g_ref[l], ln1b_ref[l])

        # ---- feed-forward: 2-D dots on flattened (B*S, H) activations ----
        h1 = _gelu(jnp.dot(_bf16(x), w1_ref[l],
                           preferred_element_type=jnp.float32) + b1_ref[l])
        h2 = jnp.dot(_bf16(h1), w2_ref[l],
                     preferred_element_type=jnp.float32) + b2_ref[l]
        x = _layer_norm(x + h2, ln2g_ref[l], ln2b_ref[l])

    # ---- classifier head on CLS rows only ----
    # gather rows b*SEQ into an 8-sublane slab (zero padded) and emit a
    # lane-dense (8, 128) slab; logit weight lives in column 0.
    cls = jnp.concatenate(
        [x[b * SEQ:b * SEQ + 1, :] for b in range(BATCH)]
        + [jnp.zeros((CLS_ROWS - BATCH, HIDDEN), jnp.float32)], axis=0)   # (8, H)
    out_ref[...] = jnp.dot(_bf16(cls), clsw_ref[...],
                           preferred_element_type=jnp.float32) + clsb_ref[...]


# ---------------- wrapper (single pallas_call, whole arrays in VMEM) ----------------
def pallas_forward(params, emb2, add_mask):
    out_pad = pl.pallas_call(
        roberta_fwd_kernel,
        out_shape=jax.ShapeDtypeStruct((CLS_ROWS, LANE), jnp.float32),
    )(emb2, add_mask,
      params['emb_ln_g'], params['emb_ln_b'],
      params['wqkv'], params['bqkv'], params['wo'], params['bo'],
      params['ln1_g'], params['ln1_b'],
      params['w1'], params['b1'], params['w2'], params['b2'],
      params['ln2_g'], params['ln2_b'],
      params['cls_w'], params['cls_b'])
    # row b = CLS logit for batch element b, logit in column 0 -> (B, 1)
    return out_pad[0:BATCH, 0:1]


# ---------------- parameters (deterministic synthetic init) ----------------
def init_params(key):
    ks = jax.random.split(key, 8)
    scale = 1.0 / math.sqrt(HEAD_DIM)

    def nrm(k, shape):
        return (0.02 * jax.random.normal(k, shape)).astype(jnp.float32)

    wqkv, wo, w1, w2 = [], [], [], []
    lkeys = jax.random.split(ks[4], N_LAYERS)
    for i in range(N_LAYERS):
        k = jax.random.split(lkeys[i], 6)
        # attention scale folded into the Q columns (bqkv Q entries are zero)
        wq = nrm(k[0], (HIDDEN, HIDDEN)) * scale
        wqkv.append(jnp.concatenate(
            [wq, nrm(k[1], (HIDDEN, HIDDEN)), nrm(k[2], (HIDDEN, HIDDEN))],
            axis=1))                                         # (H, 3H)
        wo.append(nrm(k[3], (HIDDEN, HIDDEN)))
        w1.append(nrm(k[4], (HIDDEN, INTER)))
        w2.append(nrm(k[5], (INTER, HIDDEN)))

    cls_w = jnp.pad(nrm(ks[3], (HIDDEN, 1)), ((0, 0), (0, LANE - 1)))   # (H, 128)

    return {
        'word_emb': nrm(ks[0], (VOCAB, HIDDEN)),
        'pos_emb':  nrm(ks[1], (MAX_POS, HIDDEN)),
        'type_emb': nrm(ks[2], (1, HIDDEN)),
        'emb_ln_g': jnp.ones((1, HIDDEN), jnp.float32),
        'emb_ln_b': jnp.zeros((1, HIDDEN), jnp.float32),
        # stacked per-layer weights (leading layer dim); matmul operands in bf16
        'wqkv': jnp.stack(wqkv).astype(jnp.bfloat16),        # (L, H, 3H)
        'bqkv': jnp.zeros((N_LAYERS, 1, 3 * HIDDEN), jnp.float32),
        'wo':   jnp.stack(wo).astype(jnp.bfloat16),          # (L, H, H)
        'bo':   jnp.zeros((N_LAYERS, 1, HIDDEN), jnp.float32),
        'ln1_g': jnp.ones((N_LAYERS, 1, HIDDEN), jnp.float32),
        'ln1_b': jnp.zeros((N_LAYERS, 1, HIDDEN), jnp.float32),
        'w1':   jnp.stack(w1).astype(jnp.bfloat16),          # (L, H, I)
        'b1':   jnp.zeros((N_LAYERS, 1, INTER), jnp.float32),
        'w2':   jnp.stack(w2).astype(jnp.bfloat16),          # (L, I, H)
        'b2':   jnp.zeros((N_LAYERS, 1, HIDDEN), jnp.float32),
        'ln2_g': jnp.ones((N_LAYERS, 1, HIDDEN), jnp.float32),
        'ln2_b': jnp.zeros((N_LAYERS, 1, HIDDEN), jnp.float32),
        'cls_w': cls_w.astype(jnp.bfloat16),                 # (H, 128) lane-dense
        'cls_b': jnp.zeros((1, LANE), jnp.float32),
    }


# ---------------- forward (mirrors RoBERTaClassifier.forward, eval mode) ----------------
def forward(params, input_ids, attention_mask):
    # TODO(synk): embedding-table gathers stay in plain-XLA glue outside the
    # fused kernel (could move in via one-hot MXU matmuls + scalar prefetch).
    not_pad = (input_ids != PAD_ID).astype(jnp.int32)
    pos_ids = jnp.cumsum(not_pad, axis=1) * not_pad + PAD_ID   # RoBERTa position ids
    emb = (params['word_emb'][input_ids]
           + params['pos_emb'][pos_ids]
           + params['type_emb'][0])
    emb2 = emb.reshape(BS, HIDDEN).astype(jnp.float32)         # flatten to (B*S, H)

    # additive attention mask bias, (B, S) over the key axis
    add_mask = (1.0 - attention_mask.astype(jnp.float32)) * -1e9

    # embedding dropout / pooled dropout: identity at inference
    return pallas_forward(params, emb2, add_mask)              # (B, 1)


if __name__ == "__main__":
    key = jax.random.PRNGKey(0)
    pkey, ikey = jax.random.split(key)
    params = init_params(pkey)

    input_ids = jax.random.randint(ikey, (BATCH, SEQ), 3, VOCAB, dtype=jnp.int32)
    attention_mask = jnp.ones((BATCH, SEQ), jnp.int32)
    # pad the tail of the second example to exercise the attention mask
    input_ids = input_ids.at[1, SEQ - 2:].set(PAD_ID)
    attention_mask = attention_mask.at[1, SEQ - 2:].set(0)

    logits = forward(params, input_ids, attention_mask)
    jax.block_until_ready(logits)
    assert logits.shape == (BATCH, 1) and bool(jnp.all(jnp.isfinite(logits)))
    print("KERNEL_OK")
</pallas_src>

<mosaic_0001>
module attributes {stable_mosaic.version = 11 : i64} {
  func.func @roberta_fwd_kernel(%arg0: memref<16x32xf32, #tpu.memory_space<vmem>>, %arg1: memref<2x8xf32, #tpu.memory_space<vmem>>, %arg2: memref<1x32xf32, #tpu.memory_space<vmem>>, %arg3: memref<1x32xf32, #tpu.memory_space<vmem>>, %arg4: memref<2x32x96xbf16, #tpu.memory_space<vmem>>, %arg5: memref<2x1x96xf32, #tpu.memory_space<vmem>>, %arg6: memref<2x32x32xbf16, #tpu.memory_space<vmem>>, %arg7: memref<2x1x32xf32, #tpu.memory_space<vmem>>, %arg8: memref<2x1x32xf32, #tpu.memory_space<vmem>>, %arg9: memref<2x1x32xf32, #tpu.memory_space<vmem>>, %arg10: memref<2x32x64xbf16, #tpu.memory_space<vmem>>, %arg11: memref<2x1x64xf32, #tpu.memory_space<vmem>>, %arg12: memref<2x64x32xbf16, #tpu.memory_space<vmem>>, %arg13: memref<2x1x32xf32, #tpu.memory_space<vmem>>, %arg14: memref<2x1x32xf32, #tpu.memory_space<vmem>>, %arg15: memref<2x1x32xf32, #tpu.memory_space<vmem>>, %arg16: memref<32x128xbf16, #tpu.memory_space<vmem>>, %arg17: memref<1x128xf32, #tpu.memory_space<vmem>>, %arg18: memref<8x128xf32, #tpu.memory_space<vmem>>) attributes {dimension_semantics = [], scalar_prefetch = 0 : i64, scratch_operands = 0 : i64, tpu.core_type = #tpu.core_type<tc>} {
    %c0 = arith.constant 0 : index
    %c0_0 = arith.constant 0 : index
    %0 = vector.load %arg0[%c0, %c0_0] : memref<16x32xf32, #tpu.memory_space<vmem>>, vector<16x32xf32>
    %c0_1 = arith.constant 0 : index
    %c0_2 = arith.constant 0 : index
    %1 = vector.load %arg2[%c0_1, %c0_2] : memref<1x32xf32, #tpu.memory_space<vmem>>, vector<1x32xf32>
    %c0_3 = arith.constant 0 : index
    %c0_4 = arith.constant 0 : index
    %2 = vector.load %arg3[%c0_3, %c0_4] : memref<1x32xf32, #tpu.memory_space<vmem>>, vector<1x32xf32>
    %cst = arith.constant dense<0.000000e+00> : vector<16xf32>
    %3 = vector.multi_reduction <add>, %0, %cst [1] : vector<16x32xf32> to vector<16xf32>
    %4 = vector.shape_cast %3 : vector<16xf32> to vector<16x1xf32>
    %cst_5 = arith.constant 3.200000e+01 : f32
    %5 = vector.broadcast %cst_5 : f32 to vector<16x1xf32>
    %6 = arith.divf %4, %5 : vector<16x1xf32>
    %7 = vector.broadcast %6 : vector<16x1xf32> to vector<16x32xf32>
    %8 = arith.subf %0, %7 : vector<16x32xf32>
    %9 = arith.mulf %8, %8 : vector<16x32xf32>
    %cst_6 = arith.constant dense<0.000000e+00> : vector<16xf32>
    %10 = vector.multi_reduction <add>, %9, %cst_6 [1] : vector<16x32xf32> to vector<16xf32>
    %11 = vector.shape_cast %10 : vector<16xf32> to vector<16x1xf32>
    %cst_7 = arith.constant 3.200000e+01 : f32
    %12 = vector.broadcast %cst_7 : f32 to vector<16x1xf32>
    %13 = arith.divf %11, %12 : vector<16x1xf32>
    %14 = vector.broadcast %6 : vector<16x1xf32> to vector<16x32xf32>
    %15 = arith.subf %0, %14 : vector<16x32xf32>
    %cst_8 = arith.constant 9.99999974E-6 : f32
    %16 = vector.broadcast %cst_8 : f32 to vector<16x1xf32>
    %17 = arith.addf %13, %16 : vector<16x1xf32>
    %18 = math.rsqrt %17 : vector<16x1xf32>
    %19 = vector.broadcast %18 : vector<16x1xf32> to vector<16x32xf32>
    %20 = arith.mulf %15, %19 : vector<16x32xf32>
    %21 = vector.broadcast %1 : vector<1x32xf32> to vector<16x32xf32>
    %22 = arith.mulf %20, %21 : vector<16x32xf32>
    %23 = vector.broadcast %2 : vector<1x32xf32> to vector<16x32xf32>
    %24 = arith.addf %22, %23 : vector<16x32xf32>
    %c0_9 = arith.constant 0 : index
    %c0_10 = arith.constant 0 : index
    %25 = vector.load %arg1[%c0_9, %c0_10] : memref<2x8xf32, #tpu.memory_space<vmem>>, vector<2x8xf32>
    %26 = vector.extract_strided_slice %25 {offsets = [0, 0], sizes = [1, 8], strides = [1, 1]} : vector<2x8xf32> to vector<1x8xf32>
    %27 = vector.shape_cast %26 : vector<1x8xf32> to vector<1x8xf32>
    %28 = vector.broadcast %27 : vector<1x8xf32> to vector<8x8xf32>
    %29 = vector.extract_strided_slice %25 {offsets = [1, 0], sizes = [1, 8], strides = [1, 1]} : vector<2x8xf32> to vector<1x8xf32>
    %30 = vector.shape_cast %29 : vector<1x8xf32> to vector<1x8xf32>
    %31 = vector.broadcast %30 : vector<1x8xf32> to vector<8x8xf32>
    %32 = arith.truncf %24 : vector<16x32xf32> to vector<16x32xbf16>
    %c0_11 = arith.constant 0 : index
    %c0_12 = arith.constant 0 : index
    %c0_13 = arith.constant 0 : index
    %33 = vector.load %arg4[%c0_11, %c0_12, %c0_13] : memref<2x32x96xbf16, #tpu.memory_space<vmem>>, vector<1x32x96xbf16>
    %34 = vector.shape_cast %33 : vector<1x32x96xbf16> to vector<32x96xbf16>
    %cst_14 = arith.constant dense<0.000000e+00> : vector<16x96xf32>
    %35 = tpu.matmul %32, %34, %cst_14 {dimension_numbers = #tpu.dot_dimension_numbers<[1], [0], [0], [1], [0, 0, 1, 1], [], []>} : vector<16x32xbf16>, vector<32x96xbf16>, vector<16x96xf32> -> vector<16x96xf32>
    %c0_15 = arith.constant 0 : index
    %c0_16 = arith.constant 0 : index
    %c0_17 = arith.constant 0 : index
    %36 = vector.load %arg5[%c0_15, %c0_16, %c0_17] : memref<2x1x96xf32, #tpu.memory_space<vmem>>, vector<1x1x96xf32>
    %37 = vector.shape_cast %36 : vector<1x1x96xf32> to vector<1x96xf32>
    %38 = vector.broadcast %37 : vector<1x96xf32> to vector<16x96xf32>
    %39 = arith.addf %35, %38 : vector<16x96xf32>
    %40 = arith.truncf %39 : vector<16x96xf32> to vector<16x96xbf16>
    %41 = vector.extract_strided_slice %40 {offsets = [0, 0], sizes = [8, 16], strides = [1, 1]} : vector<16x96xbf16> to vector<8x16xbf16>
    %42 = vector.extract_strided_slice %40 {offsets = [0, 32], sizes = [8, 16], strides = [1, 1]} : vector<16x96xbf16> to vector<8x16xbf16>
    %43 = vector.extract_strided_slice %40 {offsets = [0, 64], sizes = [8, 16], strides = [1, 1]} : vector<16x96xbf16> to vector<8x16xbf16>
    %cst_18 = arith.constant dense<0.000000e+00> : vector<8x8xf32>
    %44 = tpu.matmul %41, %42, %cst_18 {dimension_numbers = #tpu.dot_dimension_numbers<[1], [1], [0], [0], [0, 0, 1, 0], [], []>} : vector<8x16xbf16>, vector<8x16xbf16>, vector<8x8xf32> -> vector<8x8xf32>
    %45 = arith.addf %44, %28 : vector<8x8xf32>
    %cst_19 = arith.constant dense<0xFF800000> : vector<8xf32>
    %46 = vector.multi_reduction <maximumf>, %45, %cst_19 [1] : vector<8x8xf32> to vector<8xf32>
    %47 = vector.shape_cast %46 : vector<8xf32> to vector<8x1xf32>
    %48 = vector.broadcast %47 : vector<8x1xf32> to vector<8x8xf32>
    %49 = arith.subf %45, %48 : vector<8x8xf32>
    %50 = math.exp %49 : vector<8x8xf32>
    %cst_20 = arith.constant dense<0.000000e+00> : vector<8xf32>
    %51 = vector.multi_reduction <add>, %50, %cst_20 [1] : vector<8x8xf32> to vector<8xf32>
    %52 = vector.shape_cast %51 : vector<8xf32> to vector<8x1xf32>
    %53 = tpu.reciprocal %52 {approx = true} : vector<8x1xf32> -> vector<8x1xf32>
    %54 = vector.broadcast %53 : vector<8x1xf32> to vector<8x8xf32>
    %55 = arith.mulf %50, %54 : vector<8x8xf32>
    %56 = arith.truncf %55 : vector<8x8xf32> to vector<8x8xbf16>
    %cst_21 = arith.constant dense<0.000000e+00> : vector<8x16xf32>
    %57 = tpu.matmul %56, %43, %cst_21 {dimension_numbers = #tpu.dot_dimension_numbers<[1], [0], [0], [1], [0, 0, 1, 1], [], []>} : vector<8x8xbf16>, vector<8x16xbf16>, vector<8x16xf32> -> vector<8x16xf32>
    %58 = vector.extract_strided_slice %40 {offsets = [0, 16], sizes = [8, 16], strides = [1, 1]} : vector<16x96xbf16> to vector<8x16xbf16>
    %59 = vector.extract_strided_slice %40 {offsets = [0, 48], sizes = [8, 16], strides = [1, 1]} : vector<16x96xbf16> to vector<8x16xbf16>
    %60 = vector.extract_strided_slice %40 {offsets = [0, 80], sizes = [8, 16], strides = [1, 1]} : vector<16x96xbf16> to vector<8x16xbf16>
    %cst_22 = arith.constant dense<0.000000e+00> : vector<8x8xf32>
    %61 = tpu.matmul %58, %59, %cst_22 {dimension_numbers = #tpu.dot_dimension_numbers<[1], [1], [0], [0], [0, 0, 1, 0], [], []>} : vector<8x16xbf16>, vector<8x16xbf16>, vector<8x8xf32> -> vector<8x8xf32>
    %62 = arith.addf %61, %28 : vector<8x8xf32>
    %cst_23 = arith.constant dense<0xFF800000> : vector<8xf32>
    %63 = vector.multi_reduction <maximumf>, %62, %cst_23 [1] : vector<8x8xf32> to vector<8xf32>
    %64 = vector.shape_cast %63 : vector<8xf32> to vector<8x1xf32>
    %65 = vector.broadcast %64 : vector<8x1xf32> to vector<8x8xf32>
    %66 = arith.subf %62, %65 : vector<8x8xf32>
    %67 = math.exp %66 : vector<8x8xf32>
    %cst_24 = arith.constant dense<0.000000e+00> : vector<8xf32>
    %68 = vector.multi_reduction <add>, %67, %cst_24 [1] : vector<8x8xf32> to vector<8xf32>
    %69 = vector.shape_cast %68 : vector<8xf32> to vector<8x1xf32>
    %70 = tpu.reciprocal %69 {approx = true} : vector<8x1xf32> -> vector<8x1xf32>
    %71 = vector.broadcast %70 : vector<8x1xf32> to vector<8x8xf32>
    %72 = arith.mulf %67, %71 : vector<8x8xf32>
    %73 = arith.truncf %72 : vector<8x8xf32> to vector<8x8xbf16>
    %cst_25 = arith.constant dense<0.000000e+00> : vector<8x16xf32>
    %74 = tpu.matmul %73, %60, %cst_25 {dimension_numbers = #tpu.dot_dimension_numbers<[1], [0], [0], [1], [0, 0, 1, 1], [], []>} : vector<8x8xbf16>, vector<8x16xbf16>, vector<8x16xf32> -> vector<8x16xf32>
    %75 = tpu.concatenate %57, %74 in 1 : vector<8x16xf32>, vector<8x16xf32> -> vector<8x32xf32>
    %76 = vector.extract_strided_slice %40 {offsets = [8, 0], sizes = [8, 16], strides = [1, 1]} : vector<16x96xbf16> to vector<8x16xbf16>
    %77 = vector.extract_strided_slice %40 {offsets = [8, 32], sizes = [8, 16], strides = [1, 1]} : vector<16x96xbf16> to vector<8x16xbf16>
    %78 = vector.extract_strided_slice %40 {offsets = [8, 64], sizes = [8, 16], strides = [1, 1]} : vector<16x96xbf16> to vector<8x16xbf16>
    %cst_26 = arith.constant dense<0.000000e+00> : vector<8x8xf32>
    %79 = tpu.matmul %76, %77, %cst_26 {dimension_numbers = #tpu.dot_dimension_numbers<[1], [1], [0], [0], [0, 0, 1, 0], [], []>} : vector<8x16xbf16>, vector<8x16xbf16>, vector<8x8xf32> -> vector<8x8xf32>
    %80 = arith.addf %79, %31 : vector<8x8xf32>
    %cst_27 = arith.constant dense<0xFF800000> : vector<8xf32>
    %81 = vector.multi_reduction <maximumf>, %80, %cst_27 [1] : vector<8x8xf32> to vector<8xf32>
    %82 = vector.shape_cast %81 : vector<8xf32> to vector<8x1xf32>
    %83 = vector.broadcast %82 : vector<8x1xf32> to vector<8x8xf32>
    %84 = arith.subf %80, %83 : vector<8x8xf32>
    %85 = math.exp %84 : vector<8x8xf32>
    %cst_28 = arith.constant dense<0.000000e+00> : vector<8xf32>
    %86 = vector.multi_reduction <add>, %85, %cst_28 [1] : vector<8x8xf32> to vector<8xf32>
    %87 = vector.shape_cast %86 : vector<8xf32> to vector<8x1xf32>
    %88 = tpu.reciprocal %87 {approx = true} : vector<8x1xf32> -> vector<8x1xf32>
    %89 = vector.broadcast %88 : vector<8x1xf32> to vector<8x8xf32>
    %90 = arith.mulf %85, %89 : vector<8x8xf32>
    %91 = arith.truncf %90 : vector<8x8xf32> to vector<8x8xbf16>
    %cst_29 = arith.constant dense<0.000000e+00> : vector<8x16xf32>
    %92 = tpu.matmul %91, %78, %cst_29 {dimension_numbers = #tpu.dot_dimension_numbers<[1], [0], [0], [1], [0, 0, 1, 1], [], []>} : vector<8x8xbf16>, vector<8x16xbf16>, vector<8x16xf32> -> vector<8x16xf32>
    %93 = vector.extract_strided_slice %40 {offsets = [8, 16], sizes = [8, 16], strides = [1, 1]} : vector<16x96xbf16> to vector<8x16xbf16>
    %94 = vector.extract_strided_slice %40 {offsets = [8, 48], sizes = [8, 16], strides = [1, 1]} : vector<16x96xbf16> to vector<8x16xbf16>
    %95 = vector.extract_strided_slice %40 {offsets = [8, 80], sizes = [8, 16], strides = [1, 1]} : vector<16x96xbf16> to vector<8x16xbf16>
    %cst_30 = arith.constant dense<0.000000e+00> : vector<8x8xf32>
    %96 = tpu.matmul %93, %94, %cst_30 {dimension_numbers = #tpu.dot_dimension_numbers<[1], [1], [0], [0], [0, 0, 1, 0], [], []>} : vector<8x16xbf16>, vector<8x16xbf16>, vector<8x8xf32> -> vector<8x8xf32>
    %97 = arith.addf %96, %31 : vector<8x8xf32>
    %cst_31 = arith.constant dense<0xFF800000> : vector<8xf32>
    %98 = vector.multi_reduction <maximumf>, %97, %cst_31 [1] : vector<8x8xf32> to vector<8xf32>
    %99 = vector.shape_cast %98 : vector<8xf32> to vector<8x1xf32>
    %100 = vector.broadcast %99 : vector<8x1xf32> to vector<8x8xf32>
    %101 = arith.subf %97, %100 : vector<8x8xf32>
    %102 = math.exp %101 : vector<8x8xf32>
    %cst_32 = arith.constant dense<0.000000e+00> : vector<8xf32>
    %103 = vector.multi_reduction <add>, %102, %cst_32 [1] : vector<8x8xf32> to vector<8xf32>
    %104 = vector.shape_cast %103 : vector<8xf32> to vector<8x1xf32>
    %105 = tpu.reciprocal %104 {approx = true} : vector<8x1xf32> -> vector<8x1xf32>
    %106 = vector.broadcast %105 : vector<8x1xf32> to vector<8x8xf32>
    %107 = arith.mulf %102, %106 : vector<8x8xf32>
    %108 = arith.truncf %107 : vector<8x8xf32> to vector<8x8xbf16>
    %cst_33 = arith.constant dense<0.000000e+00> : vector<8x16xf32>
    %109 = tpu.matmul %108, %95, %cst_33 {dimension_numbers = #tpu.dot_dimension_numbers<[1], [0], [0], [1], [0, 0, 1, 1], [], []>} : vector<8x8xbf16>, vector<8x16xbf16>, vector<8x16xf32> -> vector<8x16xf32>
    %110 = tpu.concatenate %92, %109 in 1 : vector<8x16xf32>, vector<8x16xf32> -> vector<8x32xf32>
    %111 = tpu.concatenate %75, %110 in 0 : vector<8x32xf32>, vector<8x32xf32> -> vector<16x32xf32>
    %112 = arith.truncf %111 : vector<16x32xf32> to vector<16x32xbf16>
    %c0_34 = arith.constant 0 : index
    %c0_35 = arith.constant 0 : index
    %c0_36 = arith.constant 0 : index
    %113 = vector.load %arg6[%c0_34, %c0_35, %c0_36] : memref<2x32x32xbf16, #tpu.memory_space<vmem>>, vector<1x32x32xbf16>
    %114 = vector.shape_cast %113 : vector<1x32x32xbf16> to vector<32x32xbf16>
    %cst_37 = arith.constant dense<0.000000e+00> : vector<16x32xf32>
    %115 = tpu.matmul %112, %114, %cst_37 {dimension_numbers = #tpu.dot_dimension_numbers<[1], [0], [0], [1], [0, 0, 1, 1], [], []>} : vector<16x32xbf16>, vector<32x32xbf16>, vector<16x32xf32> -> vector<16x32xf32>
    %c0_38 = arith.constant 0 : index
    %c0_39 = arith.constant 0 : index
    %c0_40 = arith.constant 0 : index
    %116 = vector.load %arg7[%c0_38, %c0_39, %c0_40] : memref<2x1x32xf32, #tpu.memory_space<vmem>>, vector<1x1x32xf32>
    %117 = vector.shape_cast %116 : vector<1x1x32xf32> to vector<1x32xf32>
    %118 = vector.broadcast %117 : vector<1x32xf32> to vector<16x32xf32>
    %119 = arith.addf %115, %118 : vector<16x32xf32>
    %120 = arith.addf %24, %119 : vector<16x32xf32>
    %c0_41 = arith.constant 0 : index
    %c0_42 = arith.constant 0 : index
    %c0_43 = arith.constant 0 : index
    %121 = vector.load %arg8[%c0_41, %c0_42, %c0_43] : memref<2x1x32xf32, #tpu.memory_space<vmem>>, vector<1x1x32xf32>
    %122 = vector.shape_cast %121 : vector<1x1x32xf32> to vector<1x32xf32>
    %c0_44 = arith.constant 0 : index
    %c0_45 = arith.constant 0 : index
    %c0_46 = arith.constant 0 : index
    %123 = vector.load %arg9[%c0_44, %c0_45, %c0_46] : memref<2x1x32xf32, #tpu.memory_space<vmem>>, vector<1x1x32xf32>
    %124 = vector.shape_cast %123 : vector<1x1x32xf32> to vector<1x32xf32>
    %cst_47 = arith.constant dense<0.000000e+00> : vector<16xf32>
    %125 = vector.multi_reduction <add>, %120, %cst_47 [1] : vector<16x32xf32> to vector<16xf32>
    %126 = vector.shape_cast %125 : vector<16xf32> to vector<16x1xf32>
    %cst_48 = arith.constant 3.200000e+01 : f32
    %127 = vector.broadcast %cst_48 : f32 to vector<16x1xf32>
    %128 = arith.divf %126, %127 : vector<16x1xf32>
    %129 = vector.broadcast %128 : vector<16x1xf32> to vector<16x32xf32>
    %130 = arith.subf %120, %129 : vector<16x32xf32>
    %131 = arith.mulf %130, %130 : vector<16x32xf32>
    %cst_49 = arith.constant dense<0.000000e+00> : vector<16xf32>
    %132 = vector.multi_reduction <add>, %131, %cst_49 [1] : vector<16x32xf32> to vector<16xf32>
    %133 = vector.shape_cast %132 : vector<16xf32> to vector<16x1xf32>
    %cst_50 = arith.constant 3.200000e+01 : f32
    %134 = vector.broadcast %cst_50 : f32 to vector<16x1xf32>
    %135 = arith.divf %133, %134 : vector<16x1xf32>
    %136 = vector.broadcast %128 : vector<16x1xf32> to vector<16x32xf32>
    %137 = arith.subf %120, %136 : vector<16x32xf32>
    %cst_51 = arith.constant 9.99999974E-6 : f32
    %138 = vector.broadcast %cst_51 : f32 to vector<16x1xf32>
    %139 = arith.addf %135, %138 : vector<16x1xf32>
    %140 = math.rsqrt %139 : vector<16x1xf32>
    %141 = vector.broadcast %140 : vector<16x1xf32> to vector<16x32xf32>
    %142 = arith.mulf %137, %141 : vector<16x32xf32>
    %143 = vector.broadcast %122 : vector<1x32xf32> to vector<16x32xf32>
    %144 = arith.mulf %142, %143 : vector<16x32xf32>
    %145 = vector.broadcast %124 : vector<1x32xf32> to vector<16x32xf32>
    %146 = arith.addf %144, %145 : vector<16x32xf32>
    %147 = arith.truncf %146 : vector<16x32xf32> to vector<16x32xbf16>
    %c0_52 = arith.constant 0 : index
    %c0_53 = arith.constant 0 : index
    %c0_54 = arith.constant 0 : index
    %148 = vector.load %arg10[%c0_52, %c0_53, %c0_54] : memref<2x32x64xbf16, #tpu.memory_space<vmem>>, vector<1x32x64xbf16>
    %149 = vector.shape_cast %148 : vector<1x32x64xbf16> to vector<32x64xbf16>
    %cst_55 = arith.constant dense<0.000000e+00> : vector<16x64xf32>
    %150 = tpu.matmul %147, %149, %cst_55 {dimension_numbers = #tpu.dot_dimension_numbers<[1], [0], [0], [1], [0, 0, 1, 1], [], []>} : vector<16x32xbf16>, vector<32x64xbf16>, vector<16x64xf32> -> vector<16x64xf32>
    %c0_56 = arith.constant 0 : index
    %c0_57 = arith.constant 0 : index
    %c0_58 = arith.constant 0 : index
    %151 = vector.load %arg11[%c0_56, %c0_57, %c0_58] : memref<2x1x64xf32, #tpu.memory_space<vmem>>, vector<1x1x64xf32>
    %152 = vector.shape_cast %151 : vector<1x1x64xf32> to vector<1x64xf32>
    %153 = vector.broadcast %152 : vector<1x64xf32> to vector<16x64xf32>
    %154 = arith.addf %150, %153 : vector<16x64xf32>
    %cst_59 = arith.constant 5.000000e-01 : f32
    %155 = vector.broadcast %cst_59 : f32 to vector<16x64xf32>
    %156 = arith.mulf %155, %154 : vector<16x64xf32>
    %cst_60 = arith.constant 4.471500e-02 : f32
    %157 = vector.broadcast %cst_60 : f32 to vector<16x64xf32>
    %158 = arith.mulf %157, %154 : vector<16x64xf32>
    %159 = arith.mulf %158, %154 : vector<16x64xf32>
    %160 = arith.mulf %159, %154 : vector<16x64xf32>
    %161 = arith.addf %154, %160 : vector<16x64xf32>
    %cst_61 = arith.constant 0.797884583 : f32
    %162 = vector.broadcast %cst_61 : f32 to vector<16x64xf32>
    %163 = arith.mulf %162, %161 : vector<16x64xf32>
    %164 = math.tanh %163 : vector<16x64xf32>
    %cst_62 = arith.constant 1.000000e+00 : f32
    %165 = vector.broadcast %cst_62 : f32 to vector<16x64xf32>
    %166 = arith.addf %165, %164 : vector<16x64xf32>
    %167 = arith.mulf %156, %166 : vector<16x64xf32>
    %168 = arith.truncf %167 : vector<16x64xf32> to vector<16x64xbf16>
    %c0_63 = arith.constant 0 : index
    %c0_64 = arith.constant 0 : index
    %c0_65 = arith.constant 0 : index
    %169 = vector.load %arg12[%c0_63, %c0_64, %c0_65] : memref<2x64x32xbf16, #tpu.memory_space<vmem>>, vector<1x64x32xbf16>
    %170 = vector.shape_cast %169 : vector<1x64x32xbf16> to vector<64x32xbf16>
    %cst_66 = arith.constant dense<0.000000e+00> : vector<16x32xf32>
    %171 = tpu.matmul %168, %170, %cst_66 {dimension_numbers = #tpu.dot_dimension_numbers<[1], [0], [0], [1], [0, 0, 1, 1], [], []>} : vector<16x64xbf16>, vector<64x32xbf16>, vector<16x32xf32> -> vector<16x32xf32>
    %c0_67 = arith.constant 0 : index
    %c0_68 = arith.constant 0 : index
    %c0_69 = arith.constant 0 : index
    %172 = vector.load %arg13[%c0_67, %c0_68, %c0_69] : memref<2x1x32xf32, #tpu.memory_space<vmem>>, vector<1x1x32xf32>
    %173 = vector.shape_cast %172 : vector<1x1x32xf32> to vector<1x32xf32>
    %174 = vector.broadcast %173 : vector<1x32xf32> to vector<16x32xf32>
    %175 = arith.addf %171, %174 : vector<16x32xf32>
    %176 = arith.addf %146, %175 : vector<16x32xf32>
    %c0_70 = arith.constant 0 : index
    %c0_71 = arith.constant 0 : index
    %c0_72 = arith.constant 0 : index
    %177 = vector.load %arg14[%c0_70, %c0_71, %c0_72] : memref<2x1x32xf32, #tpu.memory_space<vmem>>, vector<1x1x32xf32>
    %178 = vector.shape_cast %177 : vector<1x1x32xf32> to vector<1x32xf32>
    %c0_73 = arith.constant 0 : index
    %c0_74 = arith.constant 0 : index
    %c0_75 = arith.constant 0 : index
    %179 = vector.load %arg15[%c0_73, %c0_74, %c0_75] : memref<2x1x32xf32, #tpu.memory_space<vmem>>, vector<1x1x32xf32>
    %180 = vector.shape_cast %179 : vector<1x1x32xf32> to vector<1x32xf32>
    %cst_76 = arith.constant dense<0.000000e+00> : vector<16xf32>
    %181 = vector.multi_reduction <add>, %176, %cst_76 [1] : vector<16x32xf32> to vector<16xf32>
    %182 = vector.shape_cast %181 : vector<16xf32> to vector<16x1xf32>
    %cst_77 = arith.constant 3.200000e+01 : f32
    %183 = vector.broadcast %cst_77 : f32 to vector<16x1xf32>
    %184 = arith.divf %182, %183 : vector<16x1xf32>
    %185 = vector.broadcast %184 : vector<16x1xf32> to vector<16x32xf32>
    %186 = arith.subf %176, %185 : vector<16x32xf32>
    %187 = arith.mulf %186, %186 : vector<16x32xf32>
    %cst_78 = arith.constant dense<0.000000e+00> : vector<16xf32>
    %188 = vector.multi_reduction <add>, %187, %cst_78 [1] : vector<16x32xf32> to vector<16xf32>
    %189 = vector.shape_cast %188 : vector<16xf32> to vector<16x1xf32>
    %cst_79 = arith.constant 3.200000e+01 : f32
    %190 = vector.broadcast %cst_79 : f32 to vector<16x1xf32>
    %191 = arith.divf %189, %190 : vector<16x1xf32>
    %192 = vector.broadcast %184 : vector<16x1xf32> to vector<16x32xf32>
    %193 = arith.subf %176, %192 : vector<16x32xf32>
    %cst_80 = arith.constant 9.99999974E-6 : f32
    %194 = vector.broadcast %cst_80 : f32 to vector<16x1xf32>
    %195 = arith.addf %191, %194 : vector<16x1xf32>
    %196 = math.rsqrt %195 : vector<16x1xf32>
    %197 = vector.broadcast %196 : vector<16x1xf32> to vector<16x32xf32>
    %198 = arith.mulf %193, %197 : vector<16x32xf32>
    %199 = vector.broadcast %178 : vector<1x32xf32> to vector<16x32xf32>
    %200 = arith.mulf %198, %199 : vector<16x32xf32>
    %201 = vector.broadcast %180 : vector<1x32xf32> to vector<16x32xf32>
    %202 = arith.addf %200, %201 : vector<16x32xf32>
    %203 = arith.truncf %202 : vector<16x32xf32> to vector<16x32xbf16>
    %c1 = arith.constant 1 : index
    %c0_81 = arith.constant 0 : index
    %c0_82 = arith.constant 0 : index
    %204 = vector.load %arg4[%c1, %c0_81, %c0_82] : memref<2x32x96xbf16, #tpu.memory_space<vmem>>, vector<1x32x96xbf16>
    %205 = vector.shape_cast %204 : vector<1x32x96xbf16> to vector<32x96xbf16>
    %cst_83 = arith.constant dense<0.000000e+00> : vector<16x96xf32>
    %206 = tpu.matmul %203, %205, %cst_83 {dimension_numbers = #tpu.dot_dimension_numbers<[1], [0], [0], [1], [0, 0, 1, 1], [], []>} : vector<16x32xbf16>, vector<32x96xbf16>, vector<16x96xf32> -> vector<16x96xf32>
    %c1_84 = arith.constant 1 : index
    %c0_85 = arith.constant 0 : index
    %c0_86 = arith.constant 0 : index
    %207 = vector.load %arg5[%c1_84, %c0_85, %c0_86] : memref<2x1x96xf32, #tpu.memory_space<vmem>>, vector<1x1x96xf32>
    %208 = vector.shape_cast %207 : vector<1x1x96xf32> to vector<1x96xf32>
    %209 = vector.broadcast %208 : vector<1x96xf32> to vector<16x96xf32>
    %210 = arith.addf %206, %209 : vector<16x96xf32>
    %211 = arith.truncf %210 : vector<16x96xf32> to vector<16x96xbf16>
    %212 = vector.extract_strided_slice %211 {offsets = [0, 0], sizes = [8, 16], strides = [1, 1]} : vector<16x96xbf16> to vector<8x16xbf16>
    %213 = vector.extract_strided_slice %211 {offsets = [0, 32], sizes = [8, 16], strides = [1, 1]} : vector<16x96xbf16> to vector<8x16xbf16>
    %214 = vector.extract_strided_slice %211 {offsets = [0, 64], sizes = [8, 16], strides = [1, 1]} : vector<16x96xbf16> to vector<8x16xbf16>
    %cst_87 = arith.constant dense<0.000000e+00> : vector<8x8xf32>
    %215 = tpu.matmul %212, %213, %cst_87 {dimension_numbers = #tpu.dot_dimension_numbers<[1], [1], [0], [0], [0, 0, 1, 0], [], []>} : vector<8x16xbf16>, vector<8x16xbf16>, vector<8x8xf32> -> vector<8x8xf32>
    %216 = arith.addf %215, %28 : vector<8x8xf32>
    %cst_88 = arith.constant dense<0xFF800000> : vector<8xf32>
    %217 = vector.multi_reduction <maximumf>, %216, %cst_88 [1] : vector<8x8xf32> to vector<8xf32>
    %218 = vector.shape_cast %217 : vector<8xf32> to vector<8x1xf32>
    %219 = vector.broadcast %218 : vector<8x1xf32> to vector<8x8xf32>
    %220 = arith.subf %216, %219 : vector<8x8xf32>
    %221 = math.exp %220 : vector<8x8xf32>
    %cst_89 = arith.constant dense<0.000000e+00> : vector<8xf32>
    %222 = vector.multi_reduction <add>, %221, %cst_89 [1] : vector<8x8xf32> to vector<8xf32>
    %223 = vector.shape_cast %222 : vector<8xf32> to vector<8x1xf32>
    %224 = tpu.reciprocal %223 {approx = true} : vector<8x1xf32> -> vector<8x1xf32>
    %225 = vector.broadcast %224 : vector<8x1xf32> to vector<8x8xf32>
    %226 = arith.mulf %221, %225 : vector<8x8xf32>
    %227 = arith.truncf %226 : vector<8x8xf32> to vector<8x8xbf16>
    %cst_90 = arith.constant dense<0.000000e+00> : vector<8x16xf32>
    %228 = tpu.matmul %227, %214, %cst_90 {dimension_numbers = #tpu.dot_dimension_numbers<[1], [0], [0], [1], [0, 0, 1, 1], [], []>} : vector<8x8xbf16>, vector<8x16xbf16>, vector<8x16xf32> -> vector<8x16xf32>
    %229 = vector.extract_strided_slice %211 {offsets = [0, 16], sizes = [8, 16], strides = [1, 1]} : vector<16x96xbf16> to vector<8x16xbf16>
    %230 = vector.extract_strided_slice %211 {offsets = [0, 48], sizes = [8, 16], strides = [1, 1]} : vector<16x96xbf16> to vector<8x16xbf16>
    %231 = vector.extract_strided_slice %211 {offsets = [0, 80], sizes = [8, 16], strides = [1, 1]} : vector<16x96xbf16> to vector<8x16xbf16>
    %cst_91 = arith.constant dense<0.000000e+00> : vector<8x8xf32>
    %232 = tpu.matmul %229, %230, %cst_91 {dimension_numbers = #tpu.dot_dimension_numbers<[1], [1], [0], [0], [0, 0, 1, 0], [], []>} : vector<8x16xbf16>, vector<8x16xbf16>, vector<8x8xf32> -> vector<8x8xf32>
    %233 = arith.addf %232, %28 : vector<8x8xf32>
    %cst_92 = arith.constant dense<0xFF800000> : vector<8xf32>
    %234 = vector.multi_reduction <maximumf>, %233, %cst_92 [1] : vector<8x8xf32> to vector<8xf32>
    %235 = vector.shape_cast %234 : vector<8xf32> to vector<8x1xf32>
    %236 = vector.broadcast %235 : vector<8x1xf32> to vector<8x8xf32>
    %237 = arith.subf %233, %236 : vector<8x8xf32>
    %238 = math.exp %237 : vector<8x8xf32>
    %cst_93 = arith.constant dense<0.000000e+00> : vector<8xf32>
    %239 = vector.multi_reduction <add>, %238, %cst_93 [1] : vector<8x8xf32> to vector<8xf32>
    %240 = vector.shape_cast %239 : vector<8xf32> to vector<8x1xf32>
    %241 = tpu.reciprocal %240 {approx = true} : vector<8x1xf32> -> vector<8x1xf32>
    %242 = vector.broadcast %241 : vector<8x1xf32> to vector<8x8xf32>
    %243 = arith.mulf %238, %242 : vector<8x8xf32>
    %244 = arith.truncf %243 : vector<8x8xf32> to vector<8x8xbf16>
    %cst_94 = arith.constant dense<0.000000e+00> : vector<8x16xf32>
    %245 = tpu.matmul %244, %231, %cst_94 {dimension_numbers = #tpu.dot_dimension_numbers<[1], [0], [0], [1], [0, 0, 1, 1], [], []>} : vector<8x8xbf16>, vector<8x16xbf16>, vector<8x16xf32> -> vector<8x16xf32>
    %246 = tpu.concatenate %228, %245 in 1 : vector<8x16xf32>, vector<8x16xf32> -> vector<8x32xf32>
    %247 = vector.extract_strided_slice %211 {offsets = [8, 0], sizes = [8, 16], strides = [1, 1]} : vector<16x96xbf16> to vector<8x16xbf16>
    %248 = vector.extract_strided_slice %211 {offsets = [8, 32], sizes = [8, 16], strides = [1, 1]} : vector<16x96xbf16> to vector<8x16xbf16>
    %249 = vector.extract_strided_slice %211 {offsets = [8, 64], sizes = [8, 16], strides = [1, 1]} : vector<16x96xbf16> to vector<8x16xbf16>
    %cst_95 = arith.constant dense<0.000000e+00> : vector<8x8xf32>
    %250 = tpu.matmul %247, %248, %cst_95 {dimension_numbers = #tpu.dot_dimension_numbers<[1], [1], [0], [0], [0, 0, 1, 0], [], []>} : vector<8x16xbf16>, vector<8x16xbf16>, vector<8x8xf32> -> vector<8x8xf32>
    %251 = arith.addf %250, %31 : vector<8x8xf32>
    %cst_96 = arith.constant dense<0xFF800000> : vector<8xf32>
    %252 = vector.multi_reduction <maximumf>, %251, %cst_96 [1] : vector<8x8xf32> to vector<8xf32>
    %253 = vector.shape_cast %252 : vector<8xf32> to vector<8x1xf32>
    %254 = vector.broadcast %253 : vector<8x1xf32> to vector<8x8xf32>
    %255 = arith.subf %251, %254 : vector<8x8xf32>
    %256 = math.exp %255 : vector<8x8xf32>
    %cst_97 = arith.constant dense<0.000000e+00> : vector<8xf32>
    %257 = vector.multi_reduction <add>, %256, %cst_97 [1] : vector<8x8xf32> to vector<8xf32>
    %258 = vector.shape_cast %257 : vector<8xf32> to vector<8x1xf32>
    %259 = tpu.reciprocal %258 {approx = true} : vector<8x1xf32> -> vector<8x1xf32>
    %260 = vector.broadcast %259 : vector<8x1xf32> to vector<8x8xf32>
    %261 = arith.mulf %256, %260 : vector<8x8xf32>
    %262 = arith.truncf %261 : vector<8x8xf32> to vector<8x8xbf16>
    %cst_98 = arith.constant dense<0.000000e+00> : vector<8x16xf32>
    %263 = tpu.matmul %262, %249, %cst_98 {dimension_numbers = #tpu.dot_dimension_numbers<[1], [0], [0], [1], [0, 0, 1, 1], [], []>} : vector<8x8xbf16>, vector<8x16xbf16>, vector<8x16xf32> -> vector<8x16xf32>
    %264 = vector.extract_strided_slice %211 {offsets = [8, 16], sizes = [8, 16], strides = [1, 1]} : vector<16x96xbf16> to vector<8x16xbf16>
    %265 = vector.extract_strided_slice %211 {offsets = [8, 48], sizes = [8, 16], strides = [1, 1]} : vector<16x96xbf16> to vector<8x16xbf16>
    %266 = vector.extract_strided_slice %211 {offsets = [8, 80], sizes = [8, 16], strides = [1, 1]} : vector<16x96xbf16> to vector<8x16xbf16>
    %cst_99 = arith.constant dense<0.000000e+00> : vector<8x8xf32>
    %267 = tpu.matmul %264, %265, %cst_99 {dimension_numbers = #tpu.dot_dimension_numbers<[1], [1], [0], [0], [0, 0, 1, 0], [], []>} : vector<8x16xbf16>, vector<8x16xbf16>, vector<8x8xf32> -> vector<8x8xf32>
    %268 = arith.addf %267, %31 : vector<8x8xf32>
    %cst_100 = arith.constant dense<0xFF800000> : vector<8xf32>
    %269 = vector.multi_reduction <maximumf>, %268, %cst_100 [1] : vector<8x8xf32> to vector<8xf32>
    %270 = vector.shape_cast %269 : vector<8xf32> to vector<8x1xf32>
    %271 = vector.broadcast %270 : vector<8x1xf32> to vector<8x8xf32>
    %272 = arith.subf %268, %271 : vector<8x8xf32>
    %273 = math.exp %272 : vector<8x8xf32>
    %cst_101 = arith.constant dense<0.000000e+00> : vector<8xf32>
    %274 = vector.multi_reduction <add>, %273, %cst_101 [1] : vector<8x8xf32> to vector<8xf32>
    %275 = vector.shape_cast %274 : vector<8xf32> to vector<8x1xf32>
    %276 = tpu.reciprocal %275 {approx = true} : vector<8x1xf32> -> vector<8x1xf32>
    %277 = vector.broadcast %276 : vector<8x1xf32> to vector<8x8xf32>
    %278 = arith.mulf %273, %277 : vector<8x8xf32>
    %279 = arith.truncf %278 : vector<8x8xf32> to vector<8x8xbf16>
    %cst_102 = arith.constant dense<0.000000e+00> : vector<8x16xf32>
    %280 = tpu.matmul %279, %266, %cst_102 {dimension_numbers = #tpu.dot_dimension_numbers<[1], [0], [0], [1], [0, 0, 1, 1], [], []>} : vector<8x8xbf16>, vector<8x16xbf16>, vector<8x16xf32> -> vector<8x16xf32>
    %281 = tpu.concatenate %263, %280 in 1 : vector<8x16xf32>, vector<8x16xf32> -> vector<8x32xf32>
    %282 = tpu.concatenate %246, %281 in 0 : vector<8x32xf32>, vector<8x32xf32> -> vector<16x32xf32>
    %283 = arith.truncf %282 : vector<16x32xf32> to vector<16x32xbf16>
    %c1_103 = arith.constant 1 : index
    %c0_104 = arith.constant 0 : index
    %c0_105 = arith.constant 0 : index
    %284 = vector.load %arg6[%c1_103, %c0_104, %c0_105] : memref<2x32x32xbf16, #tpu.memory_space<vmem>>, vector<1x32x32xbf16>
    %285 = vector.shape_cast %284 : vector<1x32x32xbf16> to vector<32x32xbf16>
    %cst_106 = arith.constant dense<0.000000e+00> : vector<16x32xf32>
    %286 = tpu.matmul %283, %285, %cst_106 {dimension_numbers = #tpu.dot_dimension_numbers<[1], [0], [0], [1], [0, 0, 1, 1], [], []>} : vector<16x32xbf16>, vector<32x32xbf16>, vector<16x32xf32> -> vector<16x32xf32>
    %c1_107 = arith.constant 1 : index
    %c0_108 = arith.constant 0 : index
    %c0_109 = arith.constant 0 : index
    %287 = vector.load %arg7[%c1_107, %c0_108, %c0_109] : memref<2x1x32xf32, #tpu.memory_space<vmem>>, vector<1x1x32xf32>
    %288 = vector.shape_cast %287 : vector<1x1x32xf32> to vector<1x32xf32>
    %289 = vector.broadcast %288 : vector<1x32xf32> to vector<16x32xf32>
    %290 = arith.addf %286, %289 : vector<16x32xf32>
    %291 = arith.addf %202, %290 : vector<16x32xf32>
    %c1_110 = arith.constant 1 : index
    %c0_111 = arith.constant 0 : index
    %c0_112 = arith.constant 0 : index
    %292 = vector.load %arg8[%c1_110, %c0_111, %c0_112] : memref<2x1x32xf32, #tpu.memory_space<vmem>>, vector<1x1x32xf32>
    %293 = vector.shape_cast %292 : vector<1x1x32xf32> to vector<1x32xf32>
    %c1_113 = arith.constant 1 : index
    %c0_114 = arith.constant 0 : index
    %c0_115 = arith.constant 0 : index
    %294 = vector.load %arg9[%c1_113, %c0_114, %c0_115] : memref<2x1x32xf32, #tpu.memory_space<vmem>>, vector<1x1x32xf32>
    %295 = vector.shape_cast %294 : vector<1x1x32xf32> to vector<1x32xf32>
    %cst_116 = arith.constant dense<0.000000e+00> : vector<16xf32>
    %296 = vector.multi_reduction <add>, %291, %cst_116 [1] : vector<16x32xf32> to vector<16xf32>
    %297 = vector.shape_cast %296 : vector<16xf32> to vector<16x1xf32>
    %cst_117 = arith.constant 3.200000e+01 : f32
    %298 = vector.broadcast %cst_117 : f32 to vector<16x1xf32>
    %299 = arith.divf %297, %298 : vector<16x1xf32>
    %300 = vector.broadcast %299 : vector<16x1xf32> to vector<16x32xf32>
    %301 = arith.subf %291, %300 : vector<16x32xf32>
    %302 = arith.mulf %301, %301 : vector<16x32xf32>
    %cst_118 = arith.constant dense<0.000000e+00> : vector<16xf32>
    %303 = vector.multi_reduction <add>, %302, %cst_118 [1] : vector<16x32xf32> to vector<16xf32>
    %304 = vector.shape_cast %303 : vector<16xf32> to vector<16x1xf32>
    %cst_119 = arith.constant 3.200000e+01 : f32
    %305 = vector.broadcast %cst_119 : f32 to vector<16x1xf32>
    %306 = arith.divf %304, %305 : vector<16x1xf32>
    %307 = vector.broadcast %299 : vector<16x1xf32> to vector<16x32xf32>
    %308 = arith.subf %291, %307 : vector<16x32xf32>
    %cst_120 = arith.constant 9.99999974E-6 : f32
    %309 = vector.broadcast %cst_120 : f32 to vector<16x1xf32>
    %310 = arith.addf %306, %309 : vector<16x1xf32>
    %311 = math.rsqrt %310 : vector<16x1xf32>
    %312 = vector.broadcast %311 : vector<16x1xf32> to vector<16x32xf32>
    %313 = arith.mulf %308, %312 : vector<16x32xf32>
    %314 = vector.broadcast %293 : vector<1x32xf32> to vector<16x32xf32>
    %315 = arith.mulf %313, %314 : vector<16x32xf32>
    %316 = vector.broadcast %295 : vector<1x32xf32> to vector<16x32xf32>
    %317 = arith.addf %315, %316 : vector<16x32xf32>
    %318 = arith.truncf %317 : vector<16x32xf32> to vector<16x32xbf16>
    %c1_121 = arith.constant 1 : index
    %c0_122 = arith.constant 0 : index
    %c0_123 = arith.constant 0 : index
    %319 = vector.load %arg10[%c1_121, %c0_122, %c0_123] : memref<2x32x64xbf16, #tpu.memory_space<vmem>>, vector<1x32x64xbf16>
    %320 = vector.shape_cast %319 : vector<1x32x64xbf16> to vector<32x64xbf16>
    %cst_124 = arith.constant dense<0.000000e+00> : vector<16x64xf32>
    %321 = tpu.matmul %318, %320, %cst_124 {dimension_numbers = #tpu.dot_dimension_numbers<[1], [0], [0], [1], [0, 0, 1, 1], [], []>} : vector<16x32xbf16>, vector<32x64xbf16>, vector<16x64xf32> -> vector<16x64xf32>
    %c1_125 = arith.constant 1 : index
    %c0_126 = arith.constant 0 : index
    %c0_127 = arith.constant 0 : index
    %322 = vector.load %arg11[%c1_125, %c0_126, %c0_127] : memref<2x1x64xf32, #tpu.memory_space<vmem>>, vector<1x1x64xf32>
    %323 = vector.shape_cast %322 : vector<1x1x64xf32> to vector<1x64xf32>
    %324 = vector.broadcast %323 : vector<1x64xf32> to vector<16x64xf32>
    %325 = arith.addf %321, %324 : vector<16x64xf32>
    %cst_128 = arith.constant 5.000000e-01 : f32
    %326 = vector.broadcast %cst_128 : f32 to vector<16x64xf32>
    %327 = arith.mulf %326, %325 : vector<16x64xf32>
    %cst_129 = arith.constant 4.471500e-02 : f32
    %328 = vector.broadcast %cst_129 : f32 to vector<16x64xf32>
    %329 = arith.mulf %328, %325 : vector<16x64xf32>
    %330 = arith.mulf %329, %325 : vector<16x64xf32>
    %331 = arith.mulf %330, %325 : vector<16x64xf32>
    %332 = arith.addf %325, %331 : vector<16x64xf32>
    %cst_130 = arith.constant 0.797884583 : f32
    %333 = vector.broadcast %cst_130 : f32 to vector<16x64xf32>
    %334 = arith.mulf %333, %332 : vector<16x64xf32>
    %335 = math.tanh %334 : vector<16x64xf32>
    %cst_131 = arith.constant 1.000000e+00 : f32
    %336 = vector.broadcast %cst_131 : f32 to vector<16x64xf32>
    %337 = arith.addf %336, %335 : vector<16x64xf32>
    %338 = arith.mulf %327, %337 : vector<16x64xf32>
    %339 = arith.truncf %338 : vector<16x64xf32> to vector<16x64xbf16>
    %c1_132 = arith.constant 1 : index
    %c0_133 = arith.constant 0 : index
    %c0_134 = arith.constant 0 : index
    %340 = vector.load %arg12[%c1_132, %c0_133, %c0_134] : memref<2x64x32xbf16, #tpu.memory_space<vmem>>, vector<1x64x32xbf16>
    %341 = vector.shape_cast %340 : vector<1x64x32xbf16> to vector<64x32xbf16>
    %cst_135 = arith.constant dense<0.000000e+00> : vector<16x32xf32>
    %342 = tpu.matmul %339, %341, %cst_135 {dimension_numbers = #tpu.dot_dimension_numbers<[1], [0], [0], [1], [0, 0, 1, 1], [], []>} : vector<16x64xbf16>, vector<64x32xbf16>, vector<16x32xf32> -> vector<16x32xf32>
    %c1_136 = arith.constant 1 : index
    %c0_137 = arith.constant 0 : index
    %c0_138 = arith.constant 0 : index
    %343 = vector.load %arg13[%c1_136, %c0_137, %c0_138] : memref<2x1x32xf32, #tpu.memory_space<vmem>>, vector<1x1x32xf32>
    %344 = vector.shape_cast %343 : vector<1x1x32xf32> to vector<1x32xf32>
    %345 = vector.broadcast %344 : vector<1x32xf32> to vector<16x32xf32>
    %346 = arith.addf %342, %345 : vector<16x32xf32>
    %347 = arith.addf %317, %346 : vector<16x32xf32>
    %c1_139 = arith.constant 1 : index
    %c0_140 = arith.constant 0 : index
    %c0_141 = arith.constant 0 : index
    %348 = vector.load %arg14[%c1_139, %c0_140, %c0_141] : memref<2x1x32xf32, #tpu.memory_space<vmem>>, vector<1x1x32xf32>
    %349 = vector.shape_cast %348 : vector<1x1x32xf32> to vector<1x32xf32>
    %c1_142 = arith.constant 1 : index
    %c0_143 = arith.constant 0 : index
    %c0_144 = arith.constant 0 : index
    %350 = vector.load %arg15[%c1_142, %c0_143, %c0_144] : memref<2x1x32xf32, #tpu.memory_space<vmem>>, vector<1x1x32xf32>
    %351 = vector.shape_cast %350 : vector<1x1x32xf32> to vector<1x32xf32>
    %cst_145 = arith.constant dense<0.000000e+00> : vector<16xf32>
    %352 = vector.multi_reduction <add>, %347, %cst_145 [1] : vector<16x32xf32> to vector<16xf32>
    %353 = vector.shape_cast %352 : vector<16xf32> to vector<16x1xf32>
    %cst_146 = arith.constant 3.200000e+01 : f32
    %354 = vector.broadcast %cst_146 : f32 to vector<16x1xf32>
    %355 = arith.divf %353, %354 : vector<16x1xf32>
    %356 = vector.broadcast %355 : vector<16x1xf32> to vector<16x32xf32>
    %357 = arith.subf %347, %356 : vector<16x32xf32>
    %358 = arith.mulf %357, %357 : vector<16x32xf32>
    %cst_147 = arith.constant dense<0.000000e+00> : vector<16xf32>
    %359 = vector.multi_reduction <add>, %358, %cst_147 [1] : vector<16x32xf32> to vector<16xf32>
    %360 = vector.shape_cast %359 : vector<16xf32> to vector<16x1xf32>
    %cst_148 = arith.constant 3.200000e+01 : f32
    %361 = vector.broadcast %cst_148 : f32 to vector<16x1xf32>
    %362 = arith.divf %360, %361 : vector<16x1xf32>
    %363 = vector.broadcast %355 : vector<16x1xf32> to vector<16x32xf32>
    %364 = arith.subf %347, %363 : vector<16x32xf32>
    %cst_149 = arith.constant 9.99999974E-6 : f32
    %365 = vector.broadcast %cst_149 : f32 to vector<16x1xf32>
    %366 = arith.addf %362, %365 : vector<16x1xf32>
    %367 = math.rsqrt %366 : vector<16x1xf32>
    %368 = vector.broadcast %367 : vector<16x1xf32> to vector<16x32xf32>
    %369 = arith.mulf %364, %368 : vector<16x32xf32>
    %370 = vector.broadcast %349 : vector<1x32xf32> to vector<16x32xf32>
    %371 = arith.mulf %369, %370 : vector<16x32xf32>
    %372 = vector.broadcast %351 : vector<1x32xf32> to vector<16x32xf32>
    %373 = arith.addf %371, %372 : vector<16x32xf32>
    %374 = vector.extract_strided_slice %373 {offsets = [0, 0], sizes = [1, 32], strides = [1, 1]} : vector<16x32xf32> to vector<1x32xf32>
    %375 = vector.extract_strided_slice %373 {offsets = [8, 0], sizes = [1, 32], strides = [1, 1]} : vector<16x32xf32> to vector<1x32xf32>
    %cst_150 = arith.constant 0.000000e+00 : f32
    %376 = vector.broadcast %cst_150 : f32 to vector<6x32xf32>
    %377 = tpu.concatenate %374, %375, %376 in 0 : vector<1x32xf32>, vector<1x32xf32>, vector<6x32xf32> -> vector<8x32xf32>
    %378 = arith.truncf %377 : vector<8x32xf32> to vector<8x32xbf16>
    %c0_151 = arith.constant 0 : index
    %c0_152 = arith.constant 0 : index
    %379 = vector.load %arg16[%c0_151, %c0_152] : memref<32x128xbf16, #tpu.memory_space<vmem>>, vector<32x128xbf16>
    %cst_153 = arith.constant dense<0.000000e+00> : vector<8x128xf32>
    %380 = tpu.matmul %378, %379, %cst_153 {dimension_numbers = #tpu.dot_dimension_numbers<[1], [0], [0], [1], [0, 0, 1, 1], [], []>} : vector<8x32xbf16>, vector<32x128xbf16>, vector<8x128xf32> -> vector<8x128xf32>
    %c0_154 = arith.constant 0 : index
    %c0_155 = arith.constant 0 : index
    %381 = vector.load %arg17[%c0_154, %c0_155] : memref<1x128xf32, #tpu.memory_space<vmem>>, vector<1x128xf32>
    %382 = vector.broadcast %381 : vector<1x128xf32> to vector<8x128xf32>
    %383 = arith.addf %380, %382 : vector<8x128xf32>
    %c0_156 = arith.constant 0 : index
    %c0_157 = arith.constant 0 : index
    %384 = vector.load %arg18[%c0_156, %c0_157] : memref<8x128xf32, #tpu.memory_space<vmem>>, vector<8x128xf32>
    tpu.vector_store %arg18[%c0_156, %c0_157], %383 {strides = array<i32>} : memref<8x128xf32, #tpu.memory_space<vmem>>, vector<8x128xf32>,
    return
  }
}

</mosaic_0001>

<bundles_post_ra>
// kernel: tpu_custom_call.1
= control target key start
LH: loop header
LB: loop body
LE: loop exit
PB: predicated region body
PF: predicated region fallthrough
CT: control target
= control target key end

     0   :  { %s3158_s0 = inlined_call_operand.hbm [shape: f32[16,32], index: 0, kind: input, shape index: {}]   ;;  %s3159_s1 = inlined_call_operand.hbm [shape: f32[2,8], index: 1, kind: input, shape index: {}]   ;;  %s3160_s2 = inlined_call_operand.hbm [shape: f32[1,32], index: 2, kind: input, shape index: {}]   ;;  %s3161_s3 = inlined_call_operand.hbm [shape: f32[1,32], index: 3, kind: input, shape index: {}]   ;;  %s3162_s4 = inlined_call_operand.vmem [shape: bf16[2,32,96], index: 4, kind: input, shape index: {}]   ;;  %s3163_s5 = inlined_call_operand.hbm [shape: f32[2,1,96], index: 5, kind: input, shape index: {}]   ;;  %s3164_s6 = inlined_call_operand.vmem [shape: bf16[2,32,32], index: 6, kind: input, shape index: {}]   ;;  %s3165_s7 = inlined_call_operand.hbm [shape: f32[2,1,32], index: 7, kind: input, shape index: {}]   ;;  %s3166_s8 = inlined_call_operand.hbm [shape: f32[2,1,32], index: 8, kind: input, shape index: {}]   ;;  %s3167_s9 = inlined_call_operand.hbm [shape: f32[2,1,32], index: 9, kind: input, shape index: {}]   ;;  %s3168_s10 = inlined_call_operand.vmem [shape: bf16[2,32,64], index: 10, kind: input, shape index: {}]   ;;  %s3169_s11 = inlined_call_operand.vmem [shape: f32[2,1,64], index: 11, kind: input, shape index: {}]   ;;  %s3170_s12 = inlined_call_operand.vmem [shape: bf16[2,64,32], index: 12, kind: input, shape index: {}]   ;;  %s3171_s13 = inlined_call_operand.vmem [shape: f32[2,1,32], index: 13, kind: input, shape index: {}]   ;;  %s3172_s14 = inlined_call_operand.vmem [shape: f32[2,1,32], index: 14, kind: input, shape index: {}]   ;;  %s3173_s15 = inlined_call_operand.vmem [shape: f32[2,1,32], index: 15, kind: input, shape index: {}]   ;;  %s3174_s16 = inlined_call_operand.vmem [shape: bf16[32,128], index: 16, kind: input, shape index: {}]   ;;  %s3175_s17 = inlined_call_operand.vmem [shape: f32[1,128], index: 17, kind: input, shape index: {}]   ;;  %s3176_s18 = inlined_call_operand.hbm [shape: f32[8,128], index: 18, kind: output, shape index: {}]  }
   0x1   :  { %3177 = sst [smem:[#allocation23_spill]] %s3158_s0 }
   0x2   :  { %3178 = sst [smem:[#allocation24_spill]] %s3159_s1 }
   0x3   :  { %3179 = sst [smem:[#allocation25_spill]] %s3160_s2 }
   0x4   :  { %23 = vsyncpa [#allocation3], 0 }
   0x5   :  { %24 = vsyncpa [#allocation6], 0 }
   0x6   :  { %25 = vsyncpa [#allocation9], 0 }
   0x7   :  { %26 = vsyncpa [#allocation12], 0 }
   0x8   :  { %27 = vsyncpa [#allocation15], 0 }
   0x9   :  { %28 = vsyncpa [#allocation4], 0  ;;  %s2658_s27 = smov [#allocation5]   ;;  %s2659_s29 = smov [#allocation8]  }
   0xa   :  { %s47_s28 = sshll.u32 %s2658_s27, 4  ;;  %s67_s30 = sshll.u32 %s2659_s29, 4  ;;  %s48_s28 = int_to_ptr.vmem [resolvable:$true] %s47_s28  ;;  %s68_s30 = int_to_ptr.vmem [resolvable:$true] %s67_s30 }
   0xb   :  { %s2474_s0 = scalar_lea.vmem %s48_s28, 32  ;;  %p2479_p1 = scmp.lt.s32.totalorder %s48_s28, %s48_s28 }
   0xc   :  { %p2475_p0 = scmp.ne.s32.totalorder %s48_s28, %s2474_s0  ;;  %p2480_p2 = scmp.lt.s32.totalorder %s2474_s0, %s2474_s0 }
   0xe   :  { %p2481_p3 = por %p2480_p2, %p2479_p1 }
  0x10   :  { %p2482_p4 = pnand %p2481_p3, %p2475_p0 }
  0x12   :  { %2485 = shalt.err (!%p2482_p4)
}
  0x13   :  { %s3180_s20 = sld [smem:[#allocation24_spill]]  ;;  %s2494_s21 = scalar_lea.vmem %s68_s30, 16 }
  0x14   :  { %p2495_p5 = scmp.ne.s32.totalorder %s68_s30, %s2494_s21  ;;  %s2498_s22 = scalar_lea.vmem %s68_s30, 32 }
  0x15   :  { %p2499_p6 = scmp.lt.s32.totalorder %s68_s30, %s68_s30  ;;  %p2500_p7 = scmp.lt.s32.totalorder %s2498_s22, %s2494_s21 }
  0x17   :  { %p2501_p8 = por %p2500_p7, %p2499_p6 }
  0x19   :  { %50 = dma.hbm_to_vmem [thread:$0]  %s3180_s20, 32, %s48_s28, [#allocation6]  }
  0x1a   :  { %p2502_p9 = pnand %p2501_p8, %p2495_p5 }
  0x1c   :  { %2505 = shalt.err (!%p2502_p9)
}
  0x1d   :  { %70 = dma.hbm_to_vmem [thread:$0]  %s3161_s3, 16, %s68_s30, [#allocation9]  }
  0x1e   :  { %s2660_s24 = smov [#allocation11]   ;;  %s2661_s26 = smov [#allocation2]  }
  0x1f   :  { %s92_s25 = sshll.u32 %s2660_s24, 4  ;;  %s34_s27 = sshll.u32 %s2661_s26, 4  ;;  %s93_s25 = int_to_ptr.vmem [resolvable:$true] %s92_s25  ;;  %s35_s27 = int_to_ptr.vmem [resolvable:$true] %s34_s27 }
  0x20   :  { %s2514_s29 = scalar_lea.vmem %s93_s25, 32  ;;  %p2519_p11 = scmp.lt.s32.totalorder %s93_s25, %s93_s25 }
  0x21   :  { %p2515_p10 = scmp.ne.s32.totalorder %s93_s25, %s2514_s29  ;;  %p2520_p12 = scmp.lt.s32.totalorder %s2514_s29, %s2514_s29 }
  0x23   :  { %p2521_p13 = por %p2520_p12, %p2519_p11 }
  0x25   :  { %p2522_p0 = pnand %p2521_p13, %p2515_p10 }
  0x27   :  { %2525 = shalt.err (!%p2522_p0)
}
  0x28   :  { %s2662_s28 = smov 16   ;;  %s2663_s0 = smov 1  }
  0x29   :  { %98 = dma.hbm_to_vmem [thread:$0]  %s3165_s7, 32, %s93_s25, [#allocation12], %s2662_s28, %s2662_s28, %s2663_s0  }
  0x2a   :  { %s2534_s30 = scalar_lea.vmem %s35_s27, 256  ;;  %p2539_p2 = scmp.lt.s32.totalorder %s35_s27, %s35_s27 }
  0x2b   :  { %p2535_p1 = scmp.ne.s32.totalorder %s35_s27, %s2534_s30  ;;  %p2540_p3 = scmp.lt.s32.totalorder %s2534_s30, %s2534_s30 }
  0x2d   :  { %p2541_p4 = por %p2540_p3, %p2539_p2 }
  0x2f   :  { %p2542_p5 = pnand %p2541_p4, %p2535_p1 }
  0x31   :  { %2545 = shalt.err (!%p2542_p5)
}
  0x32   :  { %s2664_s1 = smov 128   ;;  %s2665_s20 = smov 8  }
  0x33   :  { %s3181_s2 = sld [smem:[#allocation23_spill]]  ;;  %s2666_s23 = smov [#allocation7]  }
  0x34   :  { %s57_s24 = sshll.u32 %s2666_s23, 4  ;;  %s2667_s26 = smov [#allocation10]   ;;  %s58_s24 = int_to_ptr.vmem [resolvable:$true] %s57_s24 }
  0x35   :  { %s78_s29 = sshll.u32 %s2667_s26, 4  ;;  %s2554_s7 = scalar_lea.vmem %s58_s24, 16  ;;  %s79_s29 = int_to_ptr.vmem [resolvable:$true] %s78_s29 }
  0x36   :  { %p2555_p6 = scmp.ne.s32.totalorder %s58_s24, %s2554_s7  ;;  %s2558_s25 = scalar_lea.vmem %s58_s24, 32 }
  0x37   :  { %p2559_p7 = scmp.lt.s32.totalorder %s58_s24, %s58_s24  ;;  %p2560_p8 = scmp.lt.s32.totalorder %s2558_s25, %s2554_s7 }
  0x39   :  { %40 = dma.hbm_to_vmem [thread:$0]  %s3181_s2, 256, %s35_s27, [#allocation3], %s2664_s1, %s2664_s1, %s2665_s20  }
  0x3a   :  { %p2561_p9 = por %p2560_p8, %p2559_p7 }
  0x3c   :  { %p2562_p10 = pnand %p2561_p9, %p2555_p6 }
  0x3e   :  { %2565 = shalt.err (!%p2562_p10)
}
  0x3f   :  { %s3182_s30 = sld [smem:[#allocation25_spill]]  ;;  %s2574_s21 = scalar_lea.vmem %s79_s29, 32 }
  0x40   :  { %p2575_p11 = scmp.ne.s32.totalorder %s79_s29, %s2574_s21  ;;  %p2579_p12 = scmp.lt.s32.totalorder %s79_s29, %s79_s29 }
  0x41   :  { %p2580_p13 = scmp.lt.s32.totalorder %s2574_s21, %s2574_s21 }
  0x43   :  { %p2581_p0 = por %p2580_p13, %p2579_p12 }
  0x45   :  { %60 = dma.hbm_to_vmem [thread:$0]  %s3182_s30, 16, %s58_s24, [#allocation6]  }
  0x46   :  { %p2582_p1 = pnand %p2581_p0, %p2575_p11 }
  0x48   :  { %2585 = shalt.err (!%p2582_p1)
}
  0x49   :  { %84 = dma.hbm_to_vmem [thread:$0]  %s3163_s5, 32, %s79_s29, [#allocation9], %s2662_s28, %s2662_s28, %s2663_s0  }
  0x4a   :  { %s2668_s20 = smov [#allocation13]   ;;  %s2669_s2 = smov [#allocation14]  }
  0x4b   :  { %s104_s22 = sshll.u32 %s2668_s20, 4  ;;  %s116_s23 = sshll.u32 %s2669_s2, 4  ;;  %s105_s22 = int_to_ptr.vmem [resolvable:$true] %s104_s22  ;;  %s117_s23 = int_to_ptr.vmem [resolvable:$true] %s116_s23 }
  0x4c   :  { %s2594_s24 = scalar_lea.vmem %s105_s22, 32  ;;  %p2599_p3 = scmp.lt.s32.totalorder %s105_s22, %s105_s22 }
  0x4d   :  { %p2595_p2 = scmp.ne.s32.totalorder %s105_s22, %s2594_s24  ;;  %p2600_p4 = scmp.lt.s32.totalorder %s2594_s24, %s2594_s24 }
  0x4f   :  { %p2601_p5 = por %p2600_p4, %p2599_p3 }
  0x51   :  { %p2602_p6 = pnand %p2601_p5, %p2595_p2 }
  0x53   :  { %2605 = shalt.err (!%p2602_p6)
}
  0x54   :  { %110 = dma.hbm_to_vmem [thread:$0]  %s3166_s8, 32, %s105_s22, [#allocation12], %s2662_s28, %s2662_s28, %s2663_s0  }
  0x55   :  { %s2614_s5 = scalar_lea.vmem %s117_s23, 32  ;;  %p2619_p8 = scmp.lt.s32.totalorder %s117_s23, %s117_s23 }
  0x56   :  { %p2615_p7 = scmp.ne.s32.totalorder %s117_s23, %s2614_s5  ;;  %p2620_p9 = scmp.lt.s32.totalorder %s2614_s5, %s2614_s5 }
  0x58   :  { %p2621_p10 = por %p2620_p9, %p2619_p8 }
  0x5a   :  { %p2622_p11 = pnand %p2621_p10, %p2615_p7 }
  0x5c   :  { %2625 = shalt.err (!%p2622_p11)
}
  0x5d   :  { %122 = dma.hbm_to_vmem [thread:$0]  %s3167_s9, 32, %s117_s23, [#allocation15], %s2662_s28, %s2662_s28, %s2663_s0  }
  0x5e   :  { %2646 = dma.done.wait [#allocation3], 256  }
  0x5f   :  { %2647 = vsyncadd [#allocation3], 4294967040 }
  0x60   :  { %2648 = dma.done.wait [#allocation6], 48  }
  0x61   :  { %2649 = vsyncadd [#allocation6], 4294967248 }
  0x62   :  { %2650 = dma.done.wait [#allocation9], 48  }
  0x63   :  { %2651 = vsyncadd [#allocation9], 4294967248 }
  0x64   :  { %2652 = dma.done.wait [#allocation12], 64  }
  0x65   :  { %2653 = vsyncadd [#allocation12], 4294967232 }
  0x66   :  { %2654 = dma.done.wait [#allocation15], 32  }
  0x67   :  { %2655 = vsyncadd [#allocation15], 4294967264  ;;  %vm168_vm0 = vcmask 261120   ;;  %v164_v0 = vld [vmem:[#allocation2] sm:$0xff]  ;;  %v165_v1 = vld [vmem:[#allocation2 + $0x8] sm:$0xff]  ;;  %v2670_v15 = vmov 0.0   ;;  %v213_v53 = vlaneseq }
  0x68   :  { %v169_v2 = vsel %vm168_vm0, %v164_v0, 0.0  ;;  %v172_v3 = vsel %vm168_vm0, %v165_v1, 0.0  ;;  %v2384_v14 = vld [vmem:[%s3162_s4 + $0x8] sm:$0xff]   ;;  %2178 = vmatprep.subr.bf16.mxu0 %v2670_v15  ;;  %vm2671_vm1 = vmmov 0   ;;  %v2385_v16 = vld [vmem:[%s3162_s4] sm:$0xff]   ;;  %2186 = vmatprep.subr.bf16.mxu1 %v2670_v15  ;;  %s2672_s3 = smov 80  }
  0x69   :  { %170 = vadd.xlane.f32.xlu0 %v169_v2  ;;  %2182 = vmatprep.mubr.msk.bf16.mxu0 %vm2671_vm1, %v2670_v15  ;;  %v2025_v25 = vld [vmem:[#allocation7] ss:$0 sm:$0xff]  ;;  %v2026_v29 = vld [vmem:[#allocation8] ss:$0 sm:$0xff]  ;;  %v2027_v35 = vld [vmem:[#allocation10] ss:$0 sm:$0xff] }
  0x6a   :  { %2179 = vmatpush3.bf16.msra.mxu0 %v2384_v14  ;;  %2188 = vmatprep.mubr.msk.bf16.mxu1 %vm2671_vm1, %v2670_v15  ;;  %s2673_s30 = smov 96   ;;  %s2674_s21 = smov 112   ;;  %vm293_vm2 = vcmask 130048   ;;  %v214_v54 = vshrl.u32 %v213_v53, 7  ;;  %v212_v56 = vld [vmem:[#allocation5] sm:$0x3] }
  0x6b   :  { %2180 = vmatprep.subr.bf16.mxu0 %v2670_v15  ;;  %vm340_vm3 = vcmask 64512   ;;  %s2675_s27 = smov 48   ;;  %s2676_s1 = smov 64   ;;  %vm358_vm4 = vcmask 1043456   ;;  %vm981_vm5 = vcmask 523264   ;;  %vm1934_vm6 = vcmask 1040384  }
  0x6c   :  { %v215_v55 = vsub.s32 0, %v214_v54  ;;  %v219_v2 = vsub.s32 1, %v214_v54  ;;  %vm1936_vm7 = vcmask 1041408  }
  0x6d   :  { %173 = vadd.xlane.f32.xlu0 %v172_v3 }
  0x6e   :  { %2181 = vmatpush3.bf16.msra.mxu0 %v2385_v16  ;;  %v2875_v57 = vrot.slane %v212_v56, %v215_v55 }
  0x6f   :  { %2192 = vmatprep.subr.bf16.mxu0 %v2670_v15 }
  0xf2   :  { %v171_v4 = vpop.xlane.xlu0 %170 }
  0xf3   :  { %v176_v5 = vmul.f32 0.03125, %v171_v4 }
  0xf5   :  { %v178_v6 = vsub.f32 %v164_v0, %v176_v5 }
  0xf6   :  { %v174_v7 = vpop.xlane.xlu0 %173 }
  0xf7   :  { %v177_v8 = vmul.f32 0.03125, %v174_v7  ;;  %v180_v9 = vmul.f32 %v178_v6, %v178_v6 }
  0xf9   :  { %v179_v10 = vsub.f32 %v165_v1, %v177_v8  ;;  %v182_v11 = vsel %vm168_vm0, %v180_v9, 0.0 }
  0xfa   :  { %183 = vadd.xlane.f32.xlu1 %v182_v11 }
  0xfb   :  { %v181_v12 = vmul.f32 %v179_v10, %v179_v10 }
  0xfd   :  { %v185_v13 = vsel %vm168_vm0, %v181_v12, 0.0 }
  0xfe   :  { %186 = vadd.xlane.f32.xlu1 %v185_v13 }
 0x183   :  { %v184_v17 = vpop.xlane.xlu1 %183 }
 0x184   :  { %v188_v18 = vmul.f32 0.03125, %v184_v17 }
 0x186   :  { %v190_v19 = vadd.f32 1e-05, %v188_v18 }
 0x187   :  { %v187_v20 = vpop.xlane.xlu1 %186 }
 0x188   :  { %2406 = vrsqrt.f32 %v190_v19  ;;  %v189_v21 = vmul.f32 0.03125, %v187_v20 }
 0x18a   :  { %v191_v22 = vadd.f32 1e-05, %v189_v21 }
 0x18c   :  { %2408 = vrsqrt.f32 %v191_v22 }
 0x195   :  { %v2407_v23 = vpop.eup %2406 }
 0x196   :  { %v194_v24 = vmul.f32 %v2407_v23, %v178_v6  ;;  %v2881_v6 = vrot.slane %v212_v56, %v219_v2 }
 0x198   :  { %v202_v28 = vmul.f32 %v2025_v25, %v194_v24 }
 0x199   :  { %v2409_v26 = vpop.eup %2408 }
 0x19a   :  { %v195_v27 = vmul.f32 %v2409_v26, %v179_v10  ;;  %v2827_v31 = vadd.f32 %v2026_v29, %v202_v28 }
 0x19c   :  { %v203_v30 = vmul.f32 %v2025_v25, %v195_v27 }
 0x19e   :  { %v2829_v32 = vadd.f32 %v2026_v29, %v203_v30 }
 0x1a0   :  { %v221_v33 = vpack.c.bf16 %v2829_v32, %v2827_v31 }
 0x1a2   :  { %2183 = vmatmul.mubr.msk.bf16.vlgmr.msra.gmra.mxu0 %vm168_vm0, %v221_v33 }
 0x1a3   :  { %2194 = vmatprep.mubr.msk.bf16.mxu0 %vm2671_vm1, %v2670_v15 }
 0x262   :  { %v282_v34 = vpop.f32.mrf.mxu0 }
 0x263   :  { %v283_v38 = vadd.f32 %v2027_v35, %v282_v34 }
 0x264   :  { %v2184_v36 = vpop.f32.mrf.mxu0 }
 0x266   :  { %v285_v37 = vpop.f32.mrf.mxu0 }
 0x267   :  { %v286_v39 = vadd.f32 %v2027_v35, %v285_v37 }
 0x268   :  { %v2185_v40 = vpop.f32.mrf.mxu0 }
 0x269   :  { %v2836_v41 = vpack.c.bf16 %v286_v39, %v283_v38 }
 0x26b   :  { %404 = vrot.lane.b32.xlu1 %v2836_v41, %s2672_s3  ;;  %291 = vrot.lane.b32.xlu0 %v2836_v41, %s2673_s30  ;;  %v2843_v42 = vrot.slane %v2836_v41, 4 }
 0x26f   :  { %402 = vrot.lane.b32.xlu1 %v2836_v41, %s2674_s21  ;;  %628 = vrot.lane.b32.xlu0 %v2843_v42, %s2672_s3 }
 0x273   :  { %518 = vrot.lane.b32.xlu1 %v2843_v42, %s2673_s30 }
 0x277   :  { %626 = vrot.lane.b32.xlu1 %v2843_v42, %s2674_s21 }
 0x2dd   :  { %v292_v43 = vpop.permute.xlu0 %291  ;;  %v405_v45 = vpop.permute.xlu1 %404 }
 0x2de   :  { %v298_v44 = vsel %vm293_vm2, %v292_v43, 0  ;;  %v410_v47 = vsel %vm293_vm2, %v405_v45, 0 }
 0x2df   :  { %2187 = vmatpush3.bf16.xpose.msra.mxu1 %v298_v44 }
 0x2e0   :  { %2198 = vmatprep.subr.bf16.mxu1 %v2670_v15 }
 0x2e1   :  { %v403_v46 = vpop.permute.xlu1 %402  ;;  %v629_v50 = vpop.permute.xlu0 %628 }
 0x2e2   :  { %v634_v51 = vsel %vm293_vm2, %v629_v50, 0 }
 0x2e5   :  { %v519_v48 = vpop.permute.xlu1 %518 }
 0x2e6   :  { %2189 = vmatmul.mubr.msk.bf16.vlgmr.msra.gmra.mxu1 %vm293_vm2, %v2836_v41  ;;  %v524_v49 = vsel %vm293_vm2, %v519_v48, 0 }
 0x2e7   :  { %2199 = vmatpush3.bf16.xpose.msra.mxu1 %v410_v47  ;;  %2200 = vmatprep.mubr.msk.bf16.mxu1 %vm2671_vm1, %v2670_v15 }
 0x2e8   :  { %2210 = vmatprep.subr.bf16.mxu1 %v2670_v15 }
 0x2e9   :  { %v627_v52 = vpop.permute.xlu1 %626 }
 0x2ee   :  { %2201 = vmatmul.mubr.msk.bf16.vlgmr.msra.gmra.mxu1 %vm293_vm2, %v403_v46 }
 0x2ef   :  { %2211 = vmatpush3.bf16.xpose.msra.mxu1 %v524_v49  ;;  %2212 = vmatprep.mubr.msk.bf16.mxu1 %vm2671_vm1, %v2670_v15 }
 0x2f0   :  { %2222 = vmatprep.subr.bf16.mxu1 %v2670_v15 }
 0x2f6   :  { %2213 = vmatmul.mubr.msk.bf16.vlgmr.msra.gmra.mxu1 %vm293_vm2, %v2843_v42 }
 0x2f7   :  { %2223 = vmatpush3.bf16.xpose.msra.mxu1 %v634_v51  ;;  %2224 = vmatprep.mubr.msk.bf16.mxu1 %vm2671_vm1, %v2670_v15 }
 0x2f8   :  { %2234 = vmatprep.subr.bf16.mxu1 %v2670_v15 }
 0x2fe   :  { %2225 = vmatmul.mubr.msk.bf16.vlgmr.msra.gmra.mxu1 %vm293_vm2, %v627_v52 }
 0x2ff   :  { %2238 = vmatprep.mubr.msk.bf16.mxu1 %vm2671_vm1, %v2670_v15 }
 0x3a6   :  { %v334_v58 = vpop.f32.mrf.mxu1 }
 0x3a7   :  { %v335_v59 = vadd.f32 %v334_v58, %v2875_v57 }
 0x3a8   :  { %v2190_v60 = vpop.f32.mrf.mxu1 }
 0x3a9   :  { %v341_v61 = vsel %vm340_vm3, %v335_v59, -inf }
 0x3aa   :  { %v337_v62 = vpop.f32.mrf.mxu1  ;;  %342 = vmax.xlane.f32.xlu0 %v341_v61 }
 0x3ac   :  { %v2191_v63 = vpop.f32.mrf.mxu1 }
 0x3ae   :  { %v446_v0 = vpop.f32.mrf.mxu1 }
 0x3af   :  { %v447_v1 = vadd.f32 %v446_v0, %v2875_v57 }
 0x3b0   :  { %v2202_v3 = vpop.f32.mrf.mxu1 }
 0x3b1   :  { %v452_v4 = vsel %vm340_vm3, %v447_v1, -inf }
 0x3b2   :  { %v449_v5 = vpop.f32.mrf.mxu1  ;;  %453 = vmax.xlane.f32.xlu1 %v452_v4  ;;  %v2386_v4 = vld [vmem:[%s3164_s6 + $0x8] sm:$0xff]  }
 0x3b3   :  { %2235 = vmatpush3.bf16.msra.mxu1 %v2386_v4 }
 0x3b4   :  { %v2203_v7 = vpop.f32.mrf.mxu1  ;;  %2236 = vmatprep.subr.bf16.mxu1 %v2670_v15 }
 0x3b6   :  { %v560_v8 = vpop.f32.mrf.mxu1 }
 0x3b7   :  { %v561_v9 = vadd.f32 %v560_v8, %v2881_v6 }
 0x3b8   :  { %v2214_v10 = vpop.f32.mrf.mxu1 }
 0x3b9   :  { %v566_v11 = vsel %vm340_vm3, %v561_v9, -inf }
 0x3ba   :  { %567 = vmax.xlane.f32.xlu0 %v566_v11  ;;  %v563_v12 = vpop.f32.mrf.mxu1 }
 0x3bc   :  { %v2215_v13 = vpop.f32.mrf.mxu1 }
 0x3be   :  { %v670_v14 = vpop.f32.mrf.mxu1 }
 0x3bf   :  { %v671_v16 = vadd.f32 %v670_v14, %v2881_v6 }
 0x3c0   :  { %v2226_v17 = vpop.f32.mrf.mxu1 }
 0x3c1   :  { %v676_v18 = vsel %vm340_vm3, %v671_v16, -inf }
 0x3c2   :  { %677 = vmax.xlane.f32.xlu0 %v676_v18  ;;  %v673_v19 = vpop.f32.mrf.mxu1 }
 0x3c3   :  { %v2387_v19 = vld [vmem:[%s3164_s6] sm:$0xff]  }
 0x3c4   :  { %v2227_v20 = vpop.f32.mrf.mxu1  ;;  %2237 = vmatpush3.bf16.msra.mxu1 %v2387_v19 }
 0x3c5   :  { %2250 = vmatprep.subr.bf16.mxu1 %v2670_v15 }
 0x433   :  { %v343_v21 = vpop.xlane.xlu0 %342 }
 0x434   :  { %v344_v22 = vsub.f32 %v335_v59, %v343_v21 }
 0x436   :  { %v345_v23 = vmul.f32 1.442695, %v344_v22 }
 0x438   :  { %2410 = vpow2.f32 %v345_v23 }
 0x43b   :  { %v454_v24 = vpop.xlane.xlu1 %453 }
 0x43c   :  { %v455_v25 = vsub.f32 %v447_v1, %v454_v24 }
 0x43e   :  { %v456_v26 = vmul.f32 1.442695, %v455_v25 }
 0x440   :  { %2412 = vpow2.f32 %v456_v26 }
 0x443   :  { %v568_v27 = vpop.xlane.xlu0 %567 }
 0x444   :  { %v569_v28 = vsub.f32 %v561_v9, %v568_v27 }
 0x445   :  { %v2411_v29 = vpop.eup %2410 }
 0x446   :  { %v570_v30 = vmul.f32 1.442695, %v569_v28  ;;  %v347_v33 = vsel %vm340_vm3, %v2411_v29, 0.0 }
 0x447   :  { %348 = vadd.xlane.f32.xlu0 %v347_v33  ;;  %v2039_v33 = vld [vmem:[#allocation11] ss:$0 sm:$0xff] }
 0x448   :  { %2414 = vpow2.f32 %v570_v30 }
 0x44b   :  { %v678_v38 = vpop.xlane.xlu0 %677 }
 0x44c   :  { %v679_v39 = vsub.f32 %v671_v16, %v678_v38 }
 0x44d   :  { %v2413_v34 = vpop.eup %2412 }
 0x44e   :  { %v458_v35 = vsel %vm340_vm3, %v2413_v34, 0.0  ;;  %v680_v40 = vmul.f32 1.442695, %v679_v39 }
 0x44f   :  { %459 = vadd.xlane.f32.xlu1 %v458_v35 }
 0x450   :  { %2416 = vpow2.f32 %v680_v40 }
 0x455   :  { %v2415_v36 = vpop.eup %2414 }
 0x456   :  { %v572_v37 = vsel %vm340_vm3, %v2415_v36, 0.0 }
 0x457   :  { %573 = vadd.xlane.f32.xlu0 %v572_v37 }
 0x45d   :  { %v2417_v43 = vpop.eup %2416 }
 0x45e   :  { %v682_v44 = vsel %vm340_vm3, %v2417_v43, 0.0 }
 0x460   :  { %464 = vrot.lane.b32.xlu1 %v2836_v41, %s2675_s27 }
 0x464   :  { %578 = vrot.lane.b32.xlu1 %v2843_v42, %s2676_s1 }
 0x46d   :  { %353 = vrot.lane.b32.xlu0 %v2836_v41, %s2676_s1 }
 0x488   :  { %683 = vadd.xlane.f32.xlu1 %v682_v44 }
 0x499   :  { %688 = vrot.lane.b32.xlu1 %v2843_v42, %s2675_s27 }
 0x4d0   :  { %v349_v45 = vpop.xlane.xlu0 %348 }
 0x4d1   :  { %2418 = vrcp.f32 %v349_v45 }
 0x4d8   :  { %v460_v46 = vpop.xlane.xlu1 %459 }
 0x4d9   :  { %2420 = vrcp.f32 %v460_v46 }
 0x4dc   :  { %v465_v51 = vpop.permute.xlu1 %464 }
 0x4dd   :  { %v470_v42 = vsel %vm358_vm4, %v465_v51, 0 }
 0x4de   :  { %v2419_v47 = vpop.eup %2418 }
 0x4df   :  { %v351_v49 = vmul.f32 %v2419_v47, %v2411_v29 }
 0x4e0   :  { %v574_v48 = vpop.xlane.xlu0 %573  ;;  %v579_v55 = vpop.permute.xlu1 %578 }
 0x4e1   :  { %2422 = vrcp.f32 %v574_v48  ;;  %v352_v52 = vpack.c.bf16 %v351_v49, %v351_v49  ;;  %v584_v59 = vsel %vm358_vm4, %v579_v55, 0 }
 0x4e4   :  { %v354_v41 = vpop.permute.xlu0 %353 }
 0x4e5   :  { %v360_v50 = vsel %vm358_vm4, %v354_v41, 0 }
 0x4e6   :  { %2193 = vmatpush3.bf16.msra.mxu0 %v360_v50  ;;  %v2421_v53 = vpop.eup %2420 }
 0x4e7   :  { %2204 = vmatprep.subr.bf16.mxu0 %v2670_v15  ;;  %v462_v54 = vmul.f32 %v2421_v53, %v2413_v34 }
 0x4e9   :  { %2195 = vmatmul.mubr.msk.bf16.vlgmr.msra.gmra.mxu0 %vm340_vm3, %v352_v52  ;;  %v463_v56 = vpack.c.bf16 %v462_v54, %v462_v54 }
 0x4ea   :  { %2205 = vmatpush3.bf16.msra.mxu0 %v470_v42  ;;  %2206 = vmatprep.mubr.msk.bf16.mxu0 %vm2671_vm1, %v2670_v15  ;;  %v2389_v42 = vld [vmem:[%s3168_s10] sm:$0xff]  }
 0x4eb   :  { %2216 = vmatprep.subr.bf16.mxu0 %v2670_v15 }
 0x4ee   :  { %v2423_v58 = vpop.eup %2422 }
 0x4ef   :  { %v576_v60 = vmul.f32 %v2423_v58, %v2415_v36 }
 0x4f1   :  { %2207 = vmatmul.mubr.msk.bf16.vlgmr.msra.gmra.mxu0 %vm340_vm3, %v463_v56  ;;  %v577_v61 = vpack.c.bf16 %v576_v60, %v576_v60 }
 0x4f2   :  { %2217 = vmatpush3.bf16.msra.mxu0 %v584_v59  ;;  %2218 = vmatprep.mubr.msk.bf16.mxu0 %vm2671_vm1, %v2670_v15 }
 0x4f3   :  { %2228 = vmatprep.subr.bf16.mxu0 %v2670_v15 }
 0x4f9   :  { %2219 = vmatmul.mubr.msk.bf16.vlgmr.msra.gmra.mxu0 %vm340_vm3, %v577_v61 }
 0x4fa   :  { %2230 = vmatprep.mubr.msk.bf16.mxu0 %vm2671_vm1, %v2670_v15 }
 0x511   :  { %v684_v62 = vpop.xlane.xlu1 %683 }
 0x512   :  { %2424 = vrcp.f32 %v684_v62 }
 0x515   :  { %v689_v63 = vpop.permute.xlu1 %688 }
 0x516   :  { %v694_v0 = vsel %vm358_vm4, %v689_v63, 0  ;;  %v2043_v63 = vld [vmem:[#allocation13] ss:$0 sm:$0xff] }
 0x517   :  { %2229 = vmatpush3.bf16.msra.mxu0 %v694_v0 }
 0x518   :  { %2242 = vmatprep.subr.bf16.mxu0 %v2670_v15 }
 0x51f   :  { %v2425_v1 = vpop.eup %2424 }
 0x520   :  { %v686_v2 = vmul.f32 %v2425_v1, %v2417_v43 }
 0x522   :  { %v687_v3 = vpack.c.bf16 %v686_v2, %v686_v2 }
 0x524   :  { %2231 = vmatmul.mubr.msk.bf16.vlgmr.msra.gmra.mxu0 %vm340_vm3, %v687_v3  ;;  %v2044_v3 = vld [vmem:[#allocation14] ss:$0 sm:$0xff] }
 0x525   :  { %2246 = vmatprep.mubr.msk.bf16.mxu0 %vm2671_vm1, %v2670_v15 }
 0x5a9   :  { %v396_v5 = vpop.f32.mrf.mxu0 }
 0x5ab   :  { %v2196_v7 = vpop.f32.mrf.mxu0 }
 0x5ad   :  { %v399_v8 = vpop.f32.mrf.mxu0 }
 0x5af   :  { %v2197_v9 = vpop.f32.mrf.mxu0 }
 0x5b0   :  { %v2390_v9 = vld [vmem:[%s3170_s12 + $0x18] sm:$0xff]  }
 0x5b1   :  { %v506_v10 = vpop.f32.mrf.mxu0 }
 0x5b3   :  { %v2208_v11 = vpop.f32.mrf.mxu0 }
 0x5b4   :  { %v2392_v11 = vld [vmem:[%s3170_s12 + $0x8] sm:$0xff]  }
 0x5b5   :  { %v509_v12 = vpop.f32.mrf.mxu0 }
 0x5b6   :  { %v2393_v12 = vld [vmem:[%s3170_s12] sm:$0xff]  }
 0x5b7   :  { %v2209_v13 = vpop.f32.mrf.mxu0 }
 0x5b8   :  { %v2045_v13 = vld [vmem:[%s3169_s11] ss:$0 sm:$0xff] }
 0x5b9   :  { %v620_v14 = vpop.f32.mrf.mxu0 }
 0x5bb   :  { %v2220_v16 = vpop.f32.mrf.mxu0 }
 0x5bd   :  { %v623_v17 = vpop.f32.mrf.mxu0 }
 0x5bf   :  { %v2221_v18 = vpop.f32.mrf.mxu0 }
 0x5e4   :  { %v730_v20 = vpop.f32.mrf.mxu0 }
 0x5e5   :  { %v2374_v21 = vpack.i.bf16 %v730_v20, %v506_v10  ;;  %v2391_v10 = vld [vmem:[%s3170_s12 + $0x10] sm:$0xff]  }
 0x5e6   :  { %v2232_v22 = vpop.f32.mrf.mxu0 }
 0x5e7   :  { %2375 = vrot.lane.b32.xlu0 %v2374_v21, %s2662_s28 }
 0x5e8   :  { %v733_v23 = vpop.f32.mrf.mxu0 }
 0x5ea   :  { %v2233_v24 = vpop.f32.mrf.mxu0 }
 0x659   :  { %v2376_v25 = vpop.permute.xlu0 %2375 }
 0x65a   :  { %v2378_v26 = vunpack.i.h.bf16 %v2376_v25  ;;  %v2377_v27 = vunpack.i.l.bf16 %v2376_v25 }
 0x65c   :  { %v740_v28 = vsel %vm293_vm2, %v620_v14, %v2378_v26  ;;  %v516_v29 = vsel %vm293_vm2, %v396_v5, %v2377_v27 }
 0x65d   :  { %v741_v30 = vpack.c.bf16 %v740_v28, %v516_v29 }
 0x65f   :  { %2239 = vmatmul.mubr.msk.bf16.vlgmr.msra.gmra.mxu1 %vm168_vm0, %v741_v30 }
 0x660   :  { %2258 = vmatprep.mubr.msk.bf16.mxu1 %vm2671_vm1, %v2670_v15  ;;  %2251 = vmatpush3.bf16.msra.mxu1 %v2390_v9  ;;  %v2055_v9 = vld [vmem:[%s3172_s14] ss:$0 sm:$0xff] }
 0x661   :  { %2252 = vmatprep.subr.bf16.mxu1 %v2670_v15 }
 0x664   :  { %2253 = vmatpush3.bf16.msra.mxu1 %v2391_v10 }
 0x665   :  { %2254 = vmatprep.subr.bf16.mxu1 %v2670_v15 }
 0x668   :  { %2255 = vmatpush3.bf16.msra.mxu1 %v2392_v11 }
 0x669   :  { %2256 = vmatprep.subr.bf16.mxu1 %v2670_v15 }
 0x66c   :  { %2257 = vmatpush3.bf16.msra.mxu1 %v2393_v12 }
 0x66d   :  { %2276 = vmatprep.subr.bf16.mxu1 %v2670_v15 }
 0x71f   :  { %v802_v34 = vpop.f32.mrf.mxu1 }
 0x720   :  { %v803_v35 = vadd.f32 %v2039_v33, %v802_v34 }
 0x721   :  { %v2240_v36 = vpop.f32.mrf.mxu1 }
 0x722   :  { %v809_v37 = vadd.f32 %v803_v35, %v2827_v31 }
 0x723   :  { %v805_v38 = vpop.f32.mrf.mxu1 }
 0x724   :  { %v806_v39 = vadd.f32 %v2039_v33, %v805_v38  ;;  %v813_v40 = vsel %vm168_vm0, %v809_v37, 0.0 }
 0x725   :  { %814 = vadd.xlane.f32.xlu1 %v813_v40  ;;  %v2241_v43 = vpop.f32.mrf.mxu1 }
 0x726   :  { %v810_v44 = vadd.f32 %v806_v39, %v2829_v32  ;;  %v2388_v32 = vld [vmem:[%s3168_s10 + $0x8] sm:$0xff]  }
 0x727   :  { %2243 = vmatpush3.bf16.msra.mxu0 %v2388_v32 }
 0x728   :  { %v816_v45 = vsel %vm168_vm0, %v810_v44, 0.0  ;;  %2244 = vmatprep.subr.bf16.mxu0 %v2670_v15 }
 0x729   :  { %817 = vadd.xlane.f32.xlu0 %v816_v45 }
 0x72b   :  { %2245 = vmatpush3.bf16.msra.mxu0 %v2389_v42 }
 0x72c   :  { %2262 = vmatprep.subr.bf16.mxu0 %v2670_v15 }
 0x7ae   :  { %v815_v46 = vpop.xlane.xlu1 %814 }
 0x7af   :  { %v819_v47 = vmul.f32 0.03125, %v815_v46 }
 0x7b1   :  { %v821_v48 = vsub.f32 %v809_v37, %v819_v47 }
 0x7b2   :  { %v818_v49 = vpop.xlane.xlu0 %817 }
 0x7b3   :  { %v820_v41 = vmul.f32 0.03125, %v818_v49  ;;  %v823_v50 = vmul.f32 %v821_v48, %v821_v48 }
 0x7b5   :  { %v822_v51 = vsub.f32 %v810_v44, %v820_v41  ;;  %v825_v31 = vsel %vm168_vm0, %v823_v50, 0.0  ;;  %v2049_v44 = vld [vmem:[%s3171_s13] ss:$0 sm:$0xff] }
 0x7b6   :  { %826 = vadd.xlane.f32.xlu0 %v825_v31 }
 0x7b7   :  { %v824_v52 = vmul.f32 %v822_v51, %v822_v51 }
 0x7b9   :  { %v828_v53 = vsel %vm168_vm0, %v824_v52, 0.0 }
 0x7ba   :  { %829 = vadd.xlane.f32.xlu0 %v828_v53 }
 0x83f   :  { %v827_v54 = vpop.xlane.xlu0 %826 }
 0x840   :  { %v831_v55 = vmul.f32 0.03125, %v827_v54 }
 0x842   :  { %v833_v56 = vadd.f32 1e-05, %v831_v55 }
 0x843   :  { %v830_v58 = vpop.xlane.xlu0 %829 }
 0x844   :  { %2426 = vrsqrt.f32 %v833_v56  ;;  %v832_v59 = vmul.f32 0.03125, %v830_v58 }
 0x846   :  { %v834_v60 = vadd.f32 1e-05, %v832_v59 }
 0x848   :  { %2428 = vrsqrt.f32 %v834_v60 }
 0x851   :  { %v2427_v61 = vpop.eup %2426 }
 0x852   :  { %v837_v62 = vmul.f32 %v2427_v61, %v821_v48 }
 0x854   :  { %v845_v2 = vmul.f32 %v2043_v63, %v837_v62  ;;  %v2394_v62 = vld [vmem:[%s3162_s4 + $0x18] sm:$0xff]  }
 0x855   :  { %v2429_v0 = vpop.eup %2428 }
 0x856   :  { %v838_v1 = vmul.f32 %v2429_v0, %v822_v51  ;;  %v853_v5 = vadd.f32 %v2044_v3, %v845_v2 }
 0x858   :  { %v846_v4 = vmul.f32 %v2043_v63, %v838_v1  ;;  %v2395_v63 = vld [vmem:[%s3162_s4 + $0x10] sm:$0xff]  }
 0x85a   :  { %v854_v7 = vadd.f32 %v2044_v3, %v846_v4 }
 0x85c   :  { %v855_v8 = vpack.c.bf16 %v854_v7, %v853_v5 }
 0x85e   :  { %2247 = vmatmul.mubr.msk.bf16.vlgmr.msra.gmra.mxu0 %vm168_vm0, %v855_v8 }
 0x85f   :  { %2266 = vmatprep.mubr.msk.bf16.mxu0 %vm2671_vm1, %v2670_v15  ;;  %2263 = vmatpush3.bf16.msra.mxu0 %v2394_v62 }
 0x860   :  { %2264 = vmatprep.subr.bf16.mxu0 %v2670_v15 }
 0x863   :  { %2265 = vmatpush3.bf16.msra.mxu0 %v2395_v63 }
 0x864   :  { %2270 = vmatprep.subr.bf16.mxu0 %v2670_v15 }
 0x91e   :  { %v916_v14 = vpop.f32.mrf.mxu0 }
 0x91f   :  { %v917_v16 = vadd.f32 %v2045_v13, %v916_v14 }
 0x920   :  { %v2248_v17 = vpop.f32.mrf.mxu0 }
 0x921   :  { %v925_v18 = vmul.f32 0.044715, %v917_v16  ;;  %v923_v36 = vmul.f32 0.5, %v917_v16 }
 0x922   :  { %v919_v19 = vpop.f32.mrf.mxu0 }
 0x923   :  { %v927_v20 = vmul.f32 %v925_v18, %v917_v16  ;;  %v920_v21 = vadd.f32 %v2045_v13, %v919_v19  ;;  %v2056_v13 = vld [vmem:[%s3173_s15] ss:$0 sm:$0xff] }
 0x924   :  { %v2249_v22 = vpop.f32.mrf.mxu0 }
 0x925   :  { %v929_v23 = vmul.f32 %v927_v20, %v917_v16  ;;  %v926_v24 = vmul.f32 0.044715, %v920_v21  ;;  %v924_v37 = vmul.f32 0.5, %v920_v21  ;;  %v2061_v20 = vld [vmem:[#allocation10 + $0x1] ss:$0 sm:$0xff] }
 0x927   :  { %v931_v25 = vadd.f32 %v929_v23, %v917_v16  ;;  %v928_v26 = vmul.f32 %v926_v24, %v920_v21 }
 0x929   :  { %v933_v27 = vmul.f32 0.7978846, %v931_v25  ;;  %v930_v28 = vmul.f32 %v928_v26, %v920_v21 }
 0x92b   :  { %2430 = vtanh.f32 %v933_v27  ;;  %v932_v29 = vadd.f32 %v930_v28, %v920_v21 }
 0x92d   :  { %v934_v30 = vmul.f32 0.7978846, %v932_v29 }
 0x92f   :  { %2432 = vtanh.f32 %v934_v30 }
 0x938   :  { %v2431_v33 = vpop.eup %2430 }
 0x939   :  { %v937_v34 = vadd.f32 1.0, %v2431_v33 }
 0x93b   :  { %v939_v39 = vmul.f32 %v937_v34, %v923_v36 }
 0x93c   :  { %v2433_v35 = vpop.eup %2432 }
 0x93d   :  { %v938_v38 = vadd.f32 1.0, %v2433_v35 }
 0x93f   :  { %v940_v40 = vmul.f32 %v938_v38, %v924_v37 }
 0x941   :  { %v941_v43 = vpack.c.bf16 %v940_v40, %v939_v39 }
 0x943   :  { %2259 = vmatmul.mubr.msk.bf16.vlgmr.msra.gmra.mxu1 %vm981_vm5, %v941_v43 }
 0x944   :  { %2278 = vmatprep.mubr.msk.bf16.mxu1 %vm2671_vm1, %v2670_v15 }
 0xa03   :  { %v1019_v45 = vpop.f32.mrf.mxu1 }
 0xa04   :  { %v1020_v46 = vadd.f32 %v2049_v44, %v1019_v45 }
 0xa05   :  { %v2260_v47 = vpop.f32.mrf.mxu1 }
 0xa06   :  { %v1026_v48 = vadd.f32 %v1020_v46, %v853_v5 }
 0xa07   :  { %v1022_v49 = vpop.f32.mrf.mxu1 }
 0xa08   :  { %v1023_v41 = vadd.f32 %v2049_v44, %v1022_v49  ;;  %v1030_v50 = vsel %vm168_vm0, %v1026_v48, 0.0 }
 0xa09   :  { %1031 = vadd.xlane.f32.xlu1 %v1030_v50  ;;  %v2261_v51 = vpop.f32.mrf.mxu1 }
 0xa0a   :  { %v1027_v31 = vadd.f32 %v1023_v41, %v854_v7 }
 0xa0c   :  { %v1033_v52 = vsel %vm168_vm0, %v1027_v31, 0.0 }
 0xa0d   :  { %1034 = vadd.xlane.f32.xlu0 %v1033_v52 }
 0xa92   :  { %v1032_v53 = vpop.xlane.xlu1 %1031 }
 0xa93   :  { %v1036_v32 = vmul.f32 0.03125, %v1032_v53 }
 0xa95   :  { %v1038_v42 = vsub.f32 %v1026_v48, %v1036_v32 }
 0xa96   :  { %v1035_v54 = vpop.xlane.xlu0 %1034 }
 0xa97   :  { %v1037_v55 = vmul.f32 0.03125, %v1035_v54  ;;  %v1040_v56 = vmul.f32 %v1038_v42, %v1038_v42 }
 0xa99   :  { %v1039_v58 = vsub.f32 %v1027_v31, %v1037_v55  ;;  %v1042_v59 = vsel %vm168_vm0, %v1040_v56, 0.0 }
 0xa9a   :  { %1043 = vadd.xlane.f32.xlu1 %v1042_v59 }
 0xa9b   :  { %v1041_v60 = vmul.f32 %v1039_v58, %v1039_v58 }
 0xa9d   :  { %v1045_v61 = vsel %vm168_vm0, %v1041_v60, 0.0 }
 0xa9e   :  { %1046 = vadd.xlane.f32.xlu0 %v1045_v61 }
 0xb23   :  { %v1044_v0 = vpop.xlane.xlu1 %1043 }
 0xb24   :  { %v1048_v1 = vmul.f32 0.03125, %v1044_v0 }
 0xb26   :  { %v1050_v2 = vadd.f32 1e-05, %v1048_v1 }
 0xb27   :  { %v1047_v3 = vpop.xlane.xlu0 %1046 }
 0xb28   :  { %2434 = vrsqrt.f32 %v1050_v2  ;;  %v1049_v4 = vmul.f32 0.03125, %v1047_v3 }
 0xb2a   :  { %v1051_v5 = vadd.f32 1e-05, %v1049_v4 }
 0xb2c   :  { %2436 = vrsqrt.f32 %v1051_v5 }
 0xb35   :  { %v2435_v7 = vpop.eup %2434 }
 0xb36   :  { %v1054_v8 = vmul.f32 %v2435_v7, %v1038_v42 }
 0xb38   :  { %v1062_v12 = vmul.f32 %v2055_v9, %v1054_v8 }
 0xb39   :  { %v2437_v10 = vpop.eup %2436 }
 0xb3a   :  { %v1055_v11 = vmul.f32 %v2437_v10, %v1039_v58  ;;  %v2993_v16 = vadd.f32 %v2056_v13, %v1062_v12 }
 0xb3c   :  { %v1063_v14 = vmul.f32 %v2055_v9, %v1055_v11 }
 0xb3e   :  { %v2995_v17 = vadd.f32 %v2056_v13, %v1063_v14 }
 0xb40   :  { %v1072_v18 = vpack.c.bf16 %v2995_v17, %v2993_v16 }
 0xb42   :  { %2267 = vmatmul.mubr.msk.bf16.vlgmr.msra.gmra.mxu0 %vm168_vm0, %v1072_v18 }
 0xb43   :  { %2272 = vmatprep.mubr.msk.bf16.mxu0 %vm2671_vm1, %v2670_v15 }
 0xc02   :  { %v1135_v19 = vpop.f32.mrf.mxu0 }
 0xc03   :  { %v1136_v23 = vadd.f32 %v2061_v20, %v1135_v19 }
 0xc04   :  { %v2268_v21 = vpop.f32.mrf.mxu0 }
 0xc06   :  { %v1138_v22 = vpop.f32.mrf.mxu0 }
 0xc07   :  { %v1139_v24 = vadd.f32 %v2061_v20, %v1138_v22 }
 0xc08   :  { %v2269_v25 = vpop.f32.mrf.mxu0 }
 0xc09   :  { %v3002_v26 = vpack.c.bf16 %v1139_v24, %v1136_v23 }
 0xc0b   :  { %1254 = vrot.lane.b32.xlu0 %v3002_v26, %s2672_s3  ;;  %1144 = vrot.lane.b32.xlu1 %v3002_v26, %s2673_s30  ;;  %v3009_v27 = vrot.slane %v3002_v26, 4 }
 0xc0f   :  { %1252 = vrot.lane.b32.xlu1 %v3002_v26, %s2674_s21  ;;  %1476 = vrot.lane.b32.xlu0 %v3009_v27, %s2674_s21 }
 0xc13   :  { %1368 = vrot.lane.b32.xlu1 %v3009_v27, %s2673_s30 }
 0xc17   :  { %1478 = vrot.lane.b32.xlu1 %v3009_v27, %s2672_s3 }
 0xc7d   :  { %v1145_v28 = vpop.permute.xlu1 %1144  ;;  %v1255_v30 = vpop.permute.xlu0 %1254 }
 0xc7e   :  { %v1150_v29 = vsel %vm293_vm2, %v1145_v28, 0  ;;  %v1260_v34 = vsel %vm293_vm2, %v1255_v30, 0 }
 0xc7f   :  { %2271 = vmatpush3.bf16.xpose.msra.mxu0 %v1150_v29 }
 0xc80   :  { %2282 = vmatprep.subr.bf16.mxu0 %v2670_v15 }
 0xc81   :  { %v1253_v33 = vpop.permute.xlu1 %1252  ;;  %v1477_v39 = vpop.permute.xlu0 %1476 }
 0xc85   :  { %v1369_v35 = vpop.permute.xlu1 %1368 }
 0xc86   :  { %2273 = vmatmul.mubr.msk.bf16.vlgmr.msra.gmra.mxu0 %vm293_vm2, %v3002_v26  ;;  %v1374_v36 = vsel %vm293_vm2, %v1369_v35, 0 }
 0xc87   :  { %2283 = vmatpush3.bf16.xpose.msra.mxu0 %v1260_v34  ;;  %2284 = vmatprep.mubr.msk.bf16.mxu0 %vm2671_vm1, %v2670_v15 }
 0xc88   :  { %2294 = vmatprep.subr.bf16.mxu0 %v2670_v15 }
 0xc89   :  { %v1479_v37 = vpop.permute.xlu1 %1478 }
 0xc8a   :  { %v1484_v38 = vsel %vm293_vm2, %v1479_v37, 0 }
 0xc8e   :  { %2285 = vmatmul.mubr.msk.bf16.vlgmr.msra.gmra.mxu0 %vm293_vm2, %v1253_v33 }
 0xc8f   :  { %2295 = vmatpush3.bf16.xpose.msra.mxu0 %v1374_v36  ;;  %2296 = vmatprep.mubr.msk.bf16.mxu0 %vm2671_vm1, %v2670_v15 }
 0xc90   :  { %2306 = vmatprep.subr.bf16.mxu0 %v2670_v15 }
 0xc96   :  { %2297 = vmatmul.mubr.msk.bf16.vlgmr.msra.gmra.mxu0 %vm293_vm2, %v3009_v27 }
 0xc97   :  { %2307 = vmatpush3.bf16.xpose.msra.mxu0 %v1484_v38  ;;  %2308 = vmatprep.mubr.msk.bf16.mxu0 %vm2671_vm1, %v2670_v15 }
 0xc98   :  { %2318 = vmatprep.subr.bf16.mxu0 %v2670_v15 }
 0xc9e   :  { %2309 = vmatmul.mubr.msk.bf16.vlgmr.msra.gmra.mxu0 %vm293_vm2, %v1477_v39 }
 0xc9f   :  { %2322 = vmatprep.mubr.msk.bf16.mxu0 %vm2671_vm1, %v2670_v15 }
 0xd46   :  { %v1186_v40 = vpop.f32.mrf.mxu0 }
 0xd47   :  { %v1187_v43 = vadd.f32 %v1186_v40, %v2875_v57 }
 0xd48   :  { %v2274_v44 = vpop.f32.mrf.mxu0 }
 0xd49   :  { %v1192_v45 = vsel %vm340_vm3, %v1187_v43, -inf }
 0xd4a   :  { %1193 = vmax.xlane.f32.xlu1 %v1192_v45  ;;  %v1189_v46 = vpop.f32.mrf.mxu0 }
 0xd4c   :  { %v2275_v47 = vpop.f32.mrf.mxu0 }
 0xd4e   :  { %v1296_v48 = vpop.f32.mrf.mxu0 }
 0xd4f   :  { %v1297_v49 = vadd.f32 %v1296_v48, %v2875_v57 }
 0xd50   :  { %v2286_v41 = vpop.f32.mrf.mxu0 }
 0xd51   :  { %v1302_v50 = vsel %vm340_vm3, %v1297_v49, -inf }
 0xd52   :  { %1303 = vmax.xlane.f32.xlu0 %v1302_v50  ;;  %v1299_v51 = vpop.f32.mrf.mxu0 }
 0xd54   :  { %v2287_v31 = vpop.f32.mrf.mxu0 }
 0xd56   :  { %v1410_v52 = vpop.f32.mrf.mxu0 }
 0xd57   :  { %v1411_v53 = vadd.f32 %v1410_v52, %v2881_v6 }
 0xd58   :  { %v2298_v32 = vpop.f32.mrf.mxu0 }
 0xd59   :  { %v1416_v42 = vsel %vm340_vm3, %v1411_v53, -inf }
 0xd5a   :  { %1417 = vmax.xlane.f32.xlu0 %v1416_v42  ;;  %v1413_v54 = vpop.f32.mrf.mxu0 }
 0xd5b   :  { %v2397_v54 = vld [vmem:[%s3164_s6 + $0x10] sm:$0xff]  }
 0xd5c   :  { %v2299_v55 = vpop.f32.mrf.mxu0 }
 0xd5e   :  { %v1520_v56 = vpop.f32.mrf.mxu0 }
 0xd5f   :  { %v1521_v58 = vadd.f32 %v1520_v56, %v2881_v6 }
 0xd60   :  { %v2310_v59 = vpop.f32.mrf.mxu0 }
 0xd61   :  { %v1526_v57 = vsel %vm340_vm3, %v1521_v58, -inf }
 0xd62   :  { %1527 = vmax.xlane.f32.xlu0 %v1526_v57  ;;  %v1523_v60 = vpop.f32.mrf.mxu0 }
 0xd64   :  { %v2311_v61 = vpop.f32.mrf.mxu0 }
 0xdd3   :  { %v1194_v62 = vpop.xlane.xlu1 %1193 }
 0xdd4   :  { %v1195_v63 = vsub.f32 %v1187_v43, %v1194_v62 }
 0xdd6   :  { %v1196_v0 = vmul.f32 1.442695, %v1195_v63 }
 0xdd8   :  { %2438 = vpow2.f32 %v1196_v0 }
 0xddb   :  { %v1304_v1 = vpop.xlane.xlu0 %1303 }
 0xddc   :  { %v1305_v2 = vsub.f32 %v1297_v49, %v1304_v1  ;;  %v2396_v49 = vld [vmem:[%s3164_s6 + $0x18] sm:$0xff]  }
 0xddd   :  { %2319 = vmatpush3.bf16.msra.mxu0 %v2396_v49 }
 0xdde   :  { %v1306_v3 = vmul.f32 1.442695, %v1305_v2  ;;  %2320 = vmatprep.subr.bf16.mxu0 %v2670_v15 }
 0xde0   :  { %2440 = vpow2.f32 %v1306_v3 }
 0xde1   :  { %2321 = vmatpush3.bf16.msra.mxu0 %v2397_v54 }
 0xde2   :  { %2334 = vmatprep.subr.bf16.mxu0 %v2670_v15 }
 0xde3   :  { %v1418_v7 = vpop.xlane.xlu0 %1417 }
 0xde4   :  { %v1419_v14 = vsub.f32 %v1411_v53, %v1418_v7  ;;  %v2077_v7 = vld [vmem:[#allocation11 + $0x1] ss:$0 sm:$0xff] }
 0xde5   :  { %v2439_v4 = vpop.eup %2438 }
 0xde6   :  { %v1198_v5 = vsel %vm340_vm3, %v2439_v4, 0.0  ;;  %v1420_v18 = vmul.f32 1.442695, %v1419_v14 }
 0xde7   :  { %1199 = vadd.xlane.f32.xlu1 %v1198_v5 }
 0xdeb   :  { %v1528_v6 = vpop.xlane.xlu0 %1527 }
 0xdec   :  { %v1529_v8 = vsub.f32 %v1521_v58, %v1528_v6 }
 0xded   :  { %v2441_v9 = vpop.eup %2440 }
 0xdee   :  { %v1530_v10 = vmul.f32 1.442695, %v1529_v8  ;;  %v1308_v11 = vsel %vm340_vm3, %v2441_v9, 0.0 }
 0xdef   :  { %1309 = vadd.xlane.f32.xlu0 %v1308_v11 }
 0xdf0   :  { %2442 = vpow2.f32 %v1530_v10 }
 0xdf1   :  { %2444 = vpow2.f32 %v1420_v18 }
 0xdf8   :  { %1204 = vrot.lane.b32.xlu1 %v3002_v26, %s2676_s1 }
 0xdfd   :  { %v2443_v12 = vpop.eup %2442 }
 0xdfe   :  { %v1532_v13 = vsel %vm340_vm3, %v2443_v12, 0.0  ;;  %v2445_v19 = vpop.eup %2444 }
 0xdff   :  { %1533 = vadd.xlane.f32.xlu0 %v1532_v13  ;;  %v1422_v20 = vsel %vm340_vm3, %v2445_v19, 0.0 }
 0xe15   :  { %1314 = vrot.lane.b32.xlu0 %v3002_v26, %s2675_s27 }
 0xe1c   :  { %1423 = vadd.xlane.f32.xlu1 %v1422_v20 }
 0xe2d   :  { %1428 = vrot.lane.b32.xlu1 %v3009_v27, %s2676_s1 }
 0xe31   :  { %1538 = vrot.lane.b32.xlu1 %v3009_v27, %s2675_s27 }
 0xe70   :  { %v1200_v21 = vpop.xlane.xlu1 %1199 }
 0xe71   :  { %2446 = vrcp.f32 %v1200_v21 }
 0xe74   :  { %v1205_v22 = vpop.permute.xlu1 %1204 }
 0xe75   :  { %v1210_v23 = vsel %vm358_vm4, %v1205_v22, 0 }
 0xe76   :  { %2277 = vmatpush3.bf16.msra.mxu1 %v1210_v23 }
 0xe77   :  { %2288 = vmatprep.subr.bf16.mxu1 %v2670_v15 }
 0xe78   :  { %v1310_v24 = vpop.xlane.xlu0 %1309 }
 0xe79   :  { %2448 = vrcp.f32 %v1310_v24 }
 0xe7e   :  { %v2447_v25 = vpop.eup %2446 }
 0xe7f   :  { %v1202_v26 = vmul.f32 %v2447_v25, %v2439_v4 }
 0xe81   :  { %v1203_v28 = vpack.c.bf16 %v1202_v26, %v1202_v26 }
 0xe83   :  { %2279 = vmatmul.mubr.msk.bf16.vlgmr.msra.gmra.mxu1 %vm340_vm3, %v1203_v28 }
 0xe84   :  { %2290 = vmatprep.mubr.msk.bf16.mxu1 %vm2671_vm1, %v2670_v15 }
 0xe86   :  { %v2449_v29 = vpop.eup %2448 }
 0xe87   :  { %v1312_v30 = vmul.f32 %v2449_v29, %v2441_v9 }
 0xe88   :  { %v1534_v27 = vpop.xlane.xlu0 %1533 }
 0xe89   :  { %v1313_v35 = vpack.c.bf16 %v1312_v30, %v1312_v30 }
 0xe8c   :  { %v1315_v33 = vpop.permute.xlu0 %1314 }
 0xe8d   :  { %v1320_v34 = vsel %vm358_vm4, %v1315_v33, 0 }
 0xe8e   :  { %2289 = vmatpush3.bf16.msra.mxu1 %v1320_v34 }
 0xe8f   :  { %2300 = vmatprep.subr.bf16.mxu1 %v2670_v15 }
 0xe91   :  { %2291 = vmatmul.mubr.msk.bf16.vlgmr.msra.gmra.mxu1 %vm340_vm3, %v1313_v35 }
 0xe92   :  { %2302 = vmatprep.mubr.msk.bf16.mxu1 %vm2671_vm1, %v2670_v15 }
 0xea5   :  { %v1424_v36 = vpop.xlane.xlu1 %1423 }
 0xea6   :  { %2450 = vrcp.f32 %v1424_v36 }
 0xea7   :  { %2452 = vrcp.f32 %v1534_v27  ;;  %v2399_v27 = vld [vmem:[%s3168_s10 + $0x10] sm:$0xff]  }
 0xea9   :  { %v1429_v37 = vpop.permute.xlu1 %1428 }
 0xeaa   :  { %v1434_v38 = vsel %vm358_vm4, %v1429_v37, 0 }
 0xeab   :  { %2301 = vmatpush3.bf16.msra.mxu1 %v1434_v38 }
 0xeac   :  { %2312 = vmatprep.subr.bf16.mxu1 %v2670_v15 }
 0xead   :  { %v1539_v43 = vpop.permute.xlu1 %1538 }
 0xeae   :  { %v1544_v46 = vsel %vm358_vm4, %v1539_v43, 0 }
 0xeb3   :  { %v2451_v39 = vpop.eup %2450 }
 0xeb4   :  { %v1426_v40 = vmul.f32 %v2451_v39, %v2445_v19  ;;  %v2453_v45 = vpop.eup %2452 }
 0xeb5   :  { %v1536_v47 = vmul.f32 %v2453_v45, %v2443_v12 }
 0xeb6   :  { %v1427_v44 = vpack.c.bf16 %v1426_v40, %v1426_v40  ;;  %v2081_v40 = vld [vmem:[#allocation13 + $0x1] ss:$0 sm:$0xff] }
 0xeb7   :  { %v1537_v48 = vpack.c.bf16 %v1536_v47, %v1536_v47 }
 0xeb8   :  { %2303 = vmatmul.mubr.msk.bf16.vlgmr.msra.gmra.mxu1 %vm340_vm3, %v1427_v44 }
 0xeb9   :  { %2313 = vmatpush3.bf16.msra.mxu1 %v1544_v46  ;;  %2314 = vmatprep.mubr.msk.bf16.mxu1 %vm2671_vm1, %v2670_v15  ;;  %v2082_v46 = vld [vmem:[#allocation14 + $0x1] ss:$0 sm:$0xff] }
 0xeba   :  { %2326 = vmatprep.subr.bf16.mxu1 %v2670_v15 }
 0xec0   :  { %2315 = vmatmul.mubr.msk.bf16.vlgmr.msra.gmra.mxu1 %vm340_vm3, %v1537_v48 }
 0xec1   :  { %2330 = vmatprep.mubr.msk.bf16.mxu1 %vm2671_vm1, %v2670_v15 }
 0xf43   :  { %v1246_v41 = vpop.f32.mrf.mxu1 }
 0xf45   :  { %v2280_v50 = vpop.f32.mrf.mxu1 }
 0xf46   :  { %v2400_v50 = vld [vmem:[%s3170_s12 + $0x38] sm:$0xff]  }
 0xf47   :  { %v1249_v51 = vpop.f32.mrf.mxu1 }
 0xf48   :  { %v2401_v51 = vld [vmem:[%s3170_s12 + $0x30] sm:$0xff]  }
 0xf49   :  { %v2281_v31 = vpop.f32.mrf.mxu1 }
 0xf4a   :  { %v2402_v31 = vld [vmem:[%s3170_s12 + $0x28] sm:$0xff]  }
 0xf51   :  { %v1356_v52 = vpop.f32.mrf.mxu1 }
 0xf53   :  { %v2292_v53 = vpop.f32.mrf.mxu1 }
 0xf54   :  { %v2088_v53 = vld [vmem:[%s3169_s11 + $0x1] ss:$0 sm:$0xff] }
 0xf55   :  { %v1359_v32 = vpop.f32.mrf.mxu1 }
 0xf57   :  { %v2293_v42 = vpop.f32.mrf.mxu1 }
 0xf78   :  { %v1470_v55 = vpop.f32.mrf.mxu1 }
 0xf7a   :  { %v2304_v56 = vpop.f32.mrf.mxu1 }
 0xf7c   :  { %v1473_v58 = vpop.f32.mrf.mxu1 }
 0xf7e   :  { %v2305_v59 = vpop.f32.mrf.mxu1 }
 0xf80   :  { %v1580_v57 = vpop.f32.mrf.mxu1 }
 0xf81   :  { %v2379_v60 = vpack.i.bf16 %v1580_v57, %v1356_v52  ;;  %v2403_v52 = vld [vmem:[%s3170_s12 + $0x20] sm:$0xff]  }
 0xf82   :  { %v2316_v61 = vpop.f32.mrf.mxu1 }
 0xf83   :  { %2380 = vrot.lane.b32.xlu1 %v2379_v60, %s2662_s28 }
 0xf84   :  { %v1583_v62 = vpop.f32.mrf.mxu1 }
 0xf86   :  { %v2317_v63 = vpop.f32.mrf.mxu1 }
 0xff5   :  { %v2381_v0 = vpop.permute.xlu1 %2380 }
 0xff6   :  { %v2383_v1 = vunpack.i.h.bf16 %v2381_v0  ;;  %v2382_v2 = vunpack.i.l.bf16 %v2381_v0 }
 0xff8   :  { %v1590_v3 = vsel %vm293_vm2, %v1470_v55, %v2383_v1  ;;  %v1366_v4 = vsel %vm293_vm2, %v1246_v41, %v2382_v2 }
 0xff9   :  { %v1591_v5 = vpack.c.bf16 %v1590_v3, %v1366_v4 }
 0xffb   :  { %2323 = vmatmul.mubr.msk.bf16.vlgmr.msra.gmra.mxu0 %vm168_vm0, %v1591_v5 }
 0xffc   :  { %2342 = vmatprep.mubr.msk.bf16.mxu0 %vm2671_vm1, %v2670_v15  ;;  %2335 = vmatpush3.bf16.msra.mxu0 %v2400_v50 }
 0xffd   :  { %2336 = vmatprep.subr.bf16.mxu0 %v2670_v15 }
0x1000   :  { %2337 = vmatpush3.bf16.msra.mxu0 %v2401_v51 }
0x1001   :  { %2338 = vmatprep.subr.bf16.mxu0 %v2670_v15 }
0x1004   :  { %2339 = vmatpush3.bf16.msra.mxu0 %v2402_v31 }
0x1005   :  { %2340 = vmatprep.subr.bf16.mxu0 %v2670_v15 }
0x1008   :  { %2341 = vmatpush3.bf16.msra.mxu0 %v2403_v52 }
0x10bb   :  { %v1654_v6 = vpop.f32.mrf.mxu0 }
0x10bc   :  { %v1655_v8 = vadd.f32 %v2077_v7, %v1654_v6 }
0x10bd   :  { %v2324_v9 = vpop.f32.mrf.mxu0 }
0x10be   :  { %v1661_v10 = vadd.f32 %v1655_v8, %v2993_v16 }
0x10bf   :  { %v1657_v11 = vpop.f32.mrf.mxu0 }
0x10c0   :  { %v1658_v12 = vadd.f32 %v2077_v7, %v1657_v11  ;;  %v1667_v13 = vsel %vm168_vm0, %v1661_v10, 0.0 }
0x10c1   :  { %1668 = vadd.xlane.f32.xlu0 %v1667_v13  ;;  %v2325_v14 = vpop.f32.mrf.mxu0  ;;  %v2101_v13 = vld [vmem:[%s3171_s13 + $0x1] ss:$0 sm:$0xff] }
0x10c2   :  { %v1662_v18 = vadd.f32 %v1658_v12, %v2995_v17  ;;  %v2398_v17 = vld [vmem:[%s3168_s10 + $0x18] sm:$0xff]  }
0x10c3   :  { %2327 = vmatpush3.bf16.msra.mxu1 %v2398_v17 }
0x10c4   :  { %v1670_v19 = vsel %vm168_vm0, %v1662_v18, 0.0  ;;  %2328 = vmatprep.subr.bf16.mxu1 %v2670_v15 }
0x10c5   :  { %1671 = vadd.xlane.f32.xlu1 %v1670_v19 }
0x10c7   :  { %2329 = vmatpush3.bf16.msra.mxu1 %v2399_v27 }
0x10c8   :  { %2346 = vmatprep.subr.bf16.mxu1 %v2670_v15 }
0x114a   :  { %v1669_v20 = vpop.xlane.xlu0 %1668 }
0x114b   :  { %v1673_v21 = vmul.f32 0.03125, %v1669_v20 }
0x114d   :  { %v1675_v22 = vsub.f32 %v1661_v10, %v1673_v21 }
0x114e   :  { %v1672_v23 = vpop.xlane.xlu1 %1671 }
0x114f   :  { %v1674_v24 = vmul.f32 0.03125, %v1672_v23  ;;  %v1677_v25 = vmul.f32 %v1675_v22, %v1675_v22 }
0x1151   :  { %v1676_v26 = vsub.f32 %v1662_v18, %v1674_v24  ;;  %v1679_v16 = vsel %vm168_vm0, %v1677_v25, 0.0 }
0x1152   :  { %1680 = vadd.xlane.f32.xlu0 %v1679_v16 }
0x1153   :  { %v1678_v28 = vmul.f32 %v1676_v26, %v1676_v26 }
0x1155   :  { %v1682_v29 = vsel %vm168_vm0, %v1678_v28, 0.0 }
0x1156   :  { %1683 = vadd.xlane.f32.xlu0 %v1682_v29 }
0x11db   :  { %v1681_v30 = vpop.xlane.xlu0 %1680 }
0x11dc   :  { %v1685_v33 = vmul.f32 0.03125, %v1681_v30 }
0x11de   :  { %v1687_v34 = vadd.f32 1e-05, %v1685_v33 }
0x11df   :  { %v1684_v35 = vpop.xlane.xlu0 %1683 }
0x11e0   :  { %2454 = vrsqrt.f32 %v1687_v34  ;;  %v1686_v36 = vmul.f32 0.03125, %v1684_v35 }
0x11e2   :  { %v1688_v37 = vadd.f32 1e-05, %v1686_v36 }
0x11e4   :  { %2456 = vrsqrt.f32 %v1688_v37  ;;  %v2404_v37 = vld [vmem:[%s3174_s16 + $0x8] sm:$0xff]  }
0x11ed   :  { %v2455_v38 = vpop.eup %2454 }
0x11ee   :  { %v1691_v39 = vmul.f32 %v2455_v38, %v1675_v22  ;;  %v2405_v38 = vld [vmem:[%s3174_s16] sm:$0xff]  }
0x11f0   :  { %v1699_v45 = vmul.f32 %v2081_v40, %v1691_v39 }
0x11f1   :  { %v2457_v43 = vpop.eup %2456 }
0x11f2   :  { %v1692_v44 = vmul.f32 %v2457_v43, %v1676_v26  ;;  %v1707_v48 = vadd.f32 %v2082_v46, %v1699_v45 }
0x11f4   :  { %v1700_v47 = vmul.f32 %v2081_v40, %v1692_v44 }
0x11f6   :  { %v1708_v49 = vadd.f32 %v2082_v46, %v1700_v47 }
0x11f8   :  { %v1709_v41 = vpack.c.bf16 %v1708_v49, %v1707_v48 }
0x11fa   :  { %2331 = vmatmul.mubr.msk.bf16.vlgmr.msra.gmra.mxu1 %vm168_vm0, %v1709_v41  ;;  %v2109_v41 = vld [vmem:[%s3172_s14 + $0x1] ss:$0 sm:$0xff]  ;;  %s2677_s14 = smov [#allocation16]  }
0x11fb   :  { %2350 = vmatprep.mubr.msk.bf16.mxu1 %vm2671_vm1, %v2670_v15  ;;  %2347 = vmatpush3.bf16.msra.mxu1 %v2404_v37  ;;  %s2012_s27 = sshll.u32 %s2677_s14, 4  ;;  %s2013_s27 = int_to_ptr.vmem [resolvable:$true] %s2012_s27 }
0x11fc   :  { %2348 = vmatprep.subr.bf16.mxu1 %v2670_v15  ;;  %v2110_v15 = vld [vmem:[%s3173_s15 + $0x1] ss:$0 sm:$0xff]  ;;  %s2626_s15 = scalar_lea.vmem %s2013_s27, 128  ;;  %p2631_p13 = scmp.lt.s32.totalorder %s2013_s27, %s2013_s27 }
0x11fd   :  { %p2627_p12 = scmp.ne.s32.totalorder %s2013_s27, %s2626_s15  ;;  %p2632_p0 = scmp.lt.s32.totalorder %s2626_s15, %s2626_s15 }
0x11ff   :  { %2349 = vmatpush3.bf16.msra.mxu1 %v2405_v38  ;;  %p2633_p1 = por %p2632_p0, %p2631_p13 }
0x1201   :  { %p2634_p2 = pnand %p2633_p1, %p2627_p12 }
0x12ba   :  { %v1772_v32 = vpop.f32.mrf.mxu1 }
0x12bb   :  { %v1773_v42 = vadd.f32 %v2088_v53, %v1772_v32 }
0x12bc   :  { %v2332_v54 = vpop.f32.mrf.mxu1 }
0x12bd   :  { %v1781_v55 = vmul.f32 0.044715, %v1773_v42  ;;  %v1779_v6 = vmul.f32 0.5, %v1773_v42 }
0x12be   :  { %v1775_v56 = vpop.f32.mrf.mxu1 }
0x12bf   :  { %v1783_v58 = vmul.f32 %v1781_v55, %v1773_v42  ;;  %v1776_v59 = vadd.f32 %v2088_v53, %v1775_v56  ;;  %v2111_v56 = vld [vmem:[%s3175_s17] ss:$0 sm:$0xff] }
0x12c0   :  { %v2333_v57 = vpop.f32.mrf.mxu1 }
0x12c1   :  { %v1785_v60 = vmul.f32 %v1783_v58, %v1773_v42  ;;  %v1782_v61 = vmul.f32 0.044715, %v1776_v59  ;;  %v1780_v8 = vmul.f32 0.5, %v1776_v59 }
0x12c3   :  { %v1787_v62 = vadd.f32 %v1785_v60, %v1773_v42  ;;  %v1784_v63 = vmul.f32 %v1782_v61, %v1776_v59 }
0x12c5   :  { %v1789_v0 = vmul.f32 0.7978846, %v1787_v62  ;;  %v1786_v1 = vmul.f32 %v1784_v63, %v1776_v59 }
0x12c7   :  { %2458 = vtanh.f32 %v1789_v0  ;;  %v1788_v2 = vadd.f32 %v1786_v1, %v1776_v59 }
0x12c9   :  { %v1790_v3 = vmul.f32 0.7978846, %v1788_v2 }
0x12cb   :  { %2460 = vtanh.f32 %v1790_v3 }
0x12d4   :  { %v2459_v4 = vpop.eup %2458 }
0x12d5   :  { %v1793_v5 = vadd.f32 1.0, %v2459_v4 }
0x12d7   :  { %v1795_v10 = vmul.f32 %v1793_v5, %v1779_v6 }
0x12d8   :  { %v2461_v7 = vpop.eup %2460 }
0x12d9   :  { %v1794_v9 = vadd.f32 1.0, %v2461_v7 }
0x12db   :  { %v1796_v11 = vmul.f32 %v1794_v9, %v1780_v8 }
0x12dd   :  { %v1797_v12 = vpack.c.bf16 %v1796_v11, %v1795_v10 }
0x12df   :  { %2343 = vmatmul.mubr.msk.bf16.vlgmr.msra.gmra.mxu0 %vm981_vm5, %v1797_v12 }
0x139f   :  { %v1876_v14 = vpop.f32.mrf.mxu0 }
0x13a0   :  { %v1877_v18 = vadd.f32 %v2101_v13, %v1876_v14 }
0x13a1   :  { %v2344_v19 = vpop.f32.mrf.mxu0 }
0x13a2   :  { %v1883_v20 = vadd.f32 %v1877_v18, %v1707_v48 }
0x13a3   :  { %v1879_v21 = vpop.f32.mrf.mxu0 }
0x13a4   :  { %v1880_v22 = vadd.f32 %v2101_v13, %v1879_v21  ;;  %v1889_v23 = vsel %vm168_vm0, %v1883_v20, 0.0 }
0x13a5   :  { %1890 = vadd.xlane.f32.xlu1 %v1889_v23  ;;  %v2345_v24 = vpop.f32.mrf.mxu0 }
0x13a6   :  { %v1884_v25 = vadd.f32 %v1880_v22, %v1708_v49 }
0x13a8   :  { %v1892_v26 = vsel %vm168_vm0, %v1884_v25, 0.0 }
0x13a9   :  { %1893 = vadd.xlane.f32.xlu0 %v1892_v26 }
0x142e   :  { %v1891_v16 = vpop.xlane.xlu1 %1890 }
0x142f   :  { %v1895_v28 = vmul.f32 0.03125, %v1891_v16 }
0x1431   :  { %v1897_v29 = vsub.f32 %v1883_v20, %v1895_v28 }
0x1432   :  { %v1894_v17 = vpop.xlane.xlu0 %1893 }
0x1433   :  { %v1896_v27 = vmul.f32 0.03125, %v1894_v17  ;;  %v1899_v30 = vmul.f32 %v1897_v29, %v1897_v29 }
0x1435   :  { %v1898_v33 = vsub.f32 %v1884_v25, %v1896_v27  ;;  %v1901_v34 = vsel %vm168_vm0, %v1899_v30, 0.0 }
0x1436   :  { %1902 = vadd.xlane.f32.xlu1 %v1901_v34 }
0x1437   :  { %v1900_v35 = vmul.f32 %v1898_v33, %v1898_v33 }
0x1439   :  { %v1904_v36 = vsel %vm168_vm0, %v1900_v35, 0.0 }
0x143a   :  { %1905 = vadd.xlane.f32.xlu0 %v1904_v36 }
0x14bf   :  { %v1903_v39 = vpop.xlane.xlu1 %1902 }
0x14c0   :  { %v1907_v40 = vmul.f32 0.03125, %v1903_v39 }
0x14c2   :  { %v1909_v43 = vadd.f32 1e-05, %v1907_v40 }
0x14c3   :  { %v1906_v44 = vpop.xlane.xlu0 %1905 }
0x14c4   :  { %2462 = vrsqrt.f32 %v1909_v43  ;;  %v1908_v45 = vmul.f32 0.03125, %v1906_v44 }
0x14c6   :  { %v1910_v46 = vadd.f32 1e-05, %v1908_v45 }
0x14c8   :  { %2464 = vrsqrt.f32 %v1910_v46 }
0x14d1   :  { %v2463_v47 = vpop.eup %2462 }
0x14d2   :  { %v1913_v48 = vmul.f32 %v2463_v47, %v1897_v29 }
0x14d4   :  { %v1921_v51 = vmul.f32 %v2109_v41, %v1913_v48 }
0x14d5   :  { %v2465_v49 = vpop.eup %2464 }
0x14d6   :  { %v1914_v50 = vmul.f32 %v2465_v49, %v1898_v33  ;;  %v1929_v53 = vadd.f32 %v2110_v15, %v1921_v51 }
0x14d8   :  { %v1922_v31 = vmul.f32 %v2109_v41, %v1914_v50 }
0x14da   :  { %v1930_v52 = vadd.f32 %v2110_v15, %v1922_v31 }
0x14dc   :  { %v1932_v32 = vrot.slane %v1930_v52, 7 }
0x14de   :  { %v1935_v42 = vsel %vm1934_vm6, %v1929_v53, %v1932_v32 }
0x14df   :  { %v1937_v54 = vsel %vm1936_vm7, %v1935_v42, 0.0 }
0x14e0   :  { %v1938_v55 = vpack.c.bf16 %v1937_v54, %v1937_v54 }
0x14e2   :  { %2351 = vmatmul.mubr.msk.bf16.vlgmr.msra.gmra.mxu1 %vm168_vm0, %v1938_v55 }
0x15a2   :  { %v1999_v58 = vpop.f32.mrf.mxu1 }
0x15a3   :  { %v2000_v59 = vadd.f32 %v2111_v56, %v1999_v58 }
0x15a4   :  { %v2352_v57 = vpop.f32.mrf.mxu1 }
0x15a5   :  { %2005 = vst [vmem:[#allocation16] sm:$0xff] %v2000_v59 }
0x15a6   :  { %v2002_v60 = vpop.f32.mrf.mxu1 }
0x15a7   :  { %2637 = shalt.err (!%p2634_p2)
}
0x15a8   :  { %2015 = dma.vmem_to_hbm [thread:$0]  %s2013_s27, 128, %s3176_s18, [#allocation4]   ;;  %v2353_v61 = vpop.f32.mrf.mxu1 }
0x15a9   :  { %2656 = dma.done.wait [#allocation4], 128  }
0x15aa   :  { %2657 = vsyncadd [#allocation4], 4294967168 }
0x15ab   :  { %2019 = vsyncpa [#allocation3], 1 }
0x15ac   :  { %2020 = vsyncpa [#allocation6], 1 }
0x15ad   :  { %2021 = vsyncpa [#allocation9], 1 }
0x15ae   :  { %2022 = vsyncpa [#allocation12], 1 }
0x15af   :  { %2023 = vsyncpa [#allocation15], 1 }
0x15b0   :  { %2024 = vsyncpa [#allocation4], 1 }

</bundles_post_ra>
